<compile_context>
chip_gen: v7x
topology: tpu7x:2x2x1
jax: 0.10.0
libtpu: 0.0.40
codegen_flags: <defaults>
</compile_context>

<pallas_src>
import functools

import jax
import jax.numpy as jnp
from jax import lax
from jax.experimental import pallas as pl
from jax.experimental.pallas import tpu as pltpu


def _round_up(x, m):
    return (x + m - 1) // m * m


# ----------------------------------------------------------------------------
# Fused bottleneck kernel: one grid step == one image.
# ----------------------------------------------------------------------------
def _bottleneck_kernel(*refs, has_shortcut, ho, wo, compute_dtype):
    if has_shortcut:
        (xs_ref, w1_ref, b1_ref, w2_ref, b2_ref, w3_ref, b3_ref,
         ws_ref, bs_ref, out_ref, t1_ref, acc_ref) = refs
    else:
        (xs_ref, w1_ref, b1_ref, w2_ref, b2_ref, w3_ref, b3_ref,
         out_ref, t1_ref, acc_ref) = refs
        ws_ref = bs_ref = None

    m = ho * wo
    cin_p = xs_ref.shape[-1]
    cb_p = w1_ref.shape[-1]
    cout_p = w3_ref.shape[-1]

    # ---- conv1: 1x1 (stride already applied by the wrapper), bias + ReLU ----
    x2d = xs_ref[...].reshape(m, cin_p)                       # compute_dtype
    y1 = jnp.dot(x2d, w1_ref[...], preferred_element_type=jnp.float32)
    y1 = jnp.maximum(y1 + b1_ref[...], 0.0)                   # (m, cb_p) f32

    # ---- stage conv1 output into a zero-padded VMEM scratch.
    #      The zero border IS conv2's padding=1 (zeros in conv1-output space). ----
    t1_ref[...] = jnp.zeros_like(t1_ref)
    t1_ref[1:ho + 1, 1:wo + 1, :] = y1.reshape(ho, wo, cb_p)

    # ---- conv2: 3x3 as 9 shifted matmuls accumulated into f32 VMEM scratch ----
    acc_ref[...] = jnp.zeros_like(acc_ref)
    for dy in range(3):
        for dx in range(3):
            tap = t1_ref[dy:dy + ho, dx:dx + wo, :].reshape(m, cb_p)
            acc_ref[...] += jnp.dot(tap.astype(compute_dtype),
                                    w2_ref[dy * 3 + dx],
                                    preferred_element_type=jnp.float32)
    z2 = jnp.maximum(acc_ref[...] + b2_ref[...], 0.0)          # (m, cb_p) f32

    # ---- conv3 (1x1, no activation) + residual + final ReLU (f32 epilogue) ----
    y3 = jnp.dot(z2.astype(compute_dtype), w3_ref[...],
                 preferred_element_type=jnp.float32) + b3_ref[...]
    if has_shortcut:
        cut = jnp.dot(x2d, ws_ref[...],
                      preferred_element_type=jnp.float32) + bs_ref[...]
    else:
        cut = x2d.astype(jnp.float32)   # identity (stride==1, cin==cout, zero-padded chans)
    out = jnp.maximum(y3 + cut, 0.0)
    out_ref[...] = out.reshape(1, m, cout_p).astype(out_ref.dtype)


# ----------------------------------------------------------------------------
# Wrapper: layout conversion, channel padding, weight packing, pallas_call.
# ----------------------------------------------------------------------------
def bottleneck_forward(x_nchw, params, *, stride, shortcut,
                       compute_dtype=jnp.float32):
    """BottleneckBlock forward. Input/output are NCHW (PyTorch convention)."""
    n, cin, h, w = x_nchw.shape
    cb = params["w1"].shape[0]
    cout = params["w3"].shape[0]
    if not shortcut:
        assert stride == 1 and cin == cout, \
            "identity shortcut requires stride == 1 and in_channels == out_channels"

    ho = (h - 1) // stride + 1
    wo = (w - 1) // stride + 1
    m = ho * wo

    cin_p = _round_up(cin, 128)
    cb_p = _round_up(cb, 128)
    cout_p = _round_up(cout, 128)

    # NCHW -> strided subsample -> NHWC -> channel pad -> flatten spatial.
    xs = x_nchw[:, :, ::stride, ::stride]
    xs = jnp.transpose(xs, (0, 2, 3, 1))                         # (n, ho, wo, cin)
    xs = jnp.pad(xs, ((0, 0), (0, 0), (0, 0), (0, cin_p - cin)))
    xs = xs.reshape(n, m, cin_p).astype(compute_dtype)

    def pad2(a, r, c):
        return jnp.pad(a, ((0, r - a.shape[0]), (0, c - a.shape[1])))

    # 1x1 weights: [Cout, Cin, 1, 1] -> [Cin_p, Cout_p]; 3x3: -> [9, CB_p, CB_p].
    w1 = pad2(jnp.transpose(params["w1"][:, :, 0, 0], (1, 0)), cin_p, cb_p).astype(compute_dtype)
    b1 = pad2(params["b1"].reshape(1, cb), 1, cb_p).astype(jnp.float32)
    w2 = jnp.transpose(params["w2"], (2, 3, 1, 0)).reshape(9, cb, cb)
    w2 = jnp.pad(w2, ((0, 0), (0, cb_p - cb), (0, cb_p - cb))).astype(compute_dtype)
    b2 = pad2(params["b2"].reshape(1, cb), 1, cb_p).astype(jnp.float32)
    w3 = pad2(jnp.transpose(params["w3"][:, :, 0, 0], (1, 0)), cb_p, cout_p).astype(compute_dtype)
    b3 = pad2(params["b3"].reshape(1, cout), 1, cout_p).astype(jnp.float32)

    inputs = [xs, w1, b1, w2, b2, w3, b3]
    in_specs = [
        pl.BlockSpec((1, m, cin_p), lambda b: (b, 0, 0)),
        pl.BlockSpec((cin_p, cb_p), lambda b: (0, 0)),
        pl.BlockSpec((1, cb_p), lambda b: (0, 0)),
        pl.BlockSpec((9, cb_p, cb_p), lambda b: (0, 0, 0)),
        pl.BlockSpec((1, cb_p), lambda b: (0, 0)),
        pl.BlockSpec((cb_p, cout_p), lambda b: (0, 0)),
        pl.BlockSpec((1, cout_p), lambda b: (0, 0)),
    ]
    if shortcut:
        ws = pad2(jnp.transpose(params["ws"][:, :, 0, 0], (1, 0)), cin_p, cout_p).astype(compute_dtype)
        bs = pad2(params["bs"].reshape(1, cout), 1, cout_p).astype(jnp.float32)
        inputs += [ws, bs]
        in_specs += [
            pl.BlockSpec((cin_p, cout_p), lambda b: (0, 0)),
            pl.BlockSpec((1, cout_p), lambda b: (0, 0)),
        ]
    else:
        assert cin_p == cout_p

    out_dtype = x_nchw.dtype

    # VMEM budget (double-buffered tiles + resident weights + scratch), capped
    # below v7x's 64 MiB physical VMEM.
    itemsize_c = jnp.dtype(compute_dtype).itemsize
    xs_blk = m * cin_p * itemsize_c
    out_blk = m * cout_p * jnp.dtype(out_dtype).itemsize
    w_bytes = sum(int(a.size) * a.dtype.itemsize for a in inputs[1:])
    scratch_bytes = ((ho + 2) * (wo + 2) * cb_p + m * cb_p) * 4
    vmem_limit = int(min(max(2 * (xs_blk + out_blk + w_bytes) + scratch_bytes + (4 << 20),
                             32 << 20), 60 << 20))

    flops_per_px = 2 * (cin_p * cb_p + 9 * cb_p * cb_p + cb_p * cout_p
                        + (cin_p * cout_p if shortcut else 0))
    cost = pl.CostEstimate(
        flops=int(n * m * flops_per_px),
        transcendentals=0,
        bytes_accessed=int(n * (xs_blk + out_blk) + w_bytes),
    )

    kernel = functools.partial(
        _bottleneck_kernel, has_shortcut=shortcut, ho=ho, wo=wo,
        compute_dtype=compute_dtype)

    out = pl.pallas_call(
        kernel,
        out_shape=jax.ShapeDtypeStruct((n, m, cout_p), out_dtype),
        grid=(n,),
        in_specs=in_specs,
        out_specs=pl.BlockSpec((1, m, cout_p), lambda b: (b, 0, 0)),
        scratch_shapes=[
            pltpu.VMEM((ho + 2, wo + 2, cb_p), jnp.float32),   # zero-halo'd conv1 output
            pltpu.VMEM((m, cb_p), jnp.float32),                # conv2 f32 accumulator
        ],
        compiler_params=pltpu.CompilerParams(
            dimension_semantics=("parallel",),
            vmem_limit_bytes=vmem_limit),
        cost_estimate=cost,
    )(*inputs)

    out = out[:, :, :cout].reshape(n, ho, wo, cout)
    return jnp.transpose(out, (0, 3, 1, 2))  # -> NCHW


# ----------------------------------------------------------------------------
# Pure-JAX reference (lax.conv) to validate the Pallas implementation.
# ----------------------------------------------------------------------------
def _conv_ref(x, w, b, stride, padding, relu):
    dn = ("NCHW", "OIHW", "NCHW")
    y = lax.conv_general_dilated(
        x, w, window_strides=(stride, stride),
        padding=[(padding, padding), (padding, padding)],
        dimension_numbers=dn,
    )
    y = y + b.reshape(1, -1, 1, 1)
    return jnp.maximum(y, 0.0) if relu else y


def bottleneck_ref(x, params, *, stride, shortcut):
    cut = x
    if shortcut:
        cut = _conv_ref(x, params["ws"], params["bs"].reshape(-1), stride, 0, False)
    out = _conv_ref(x, params["w1"], params["b1"].reshape(-1), stride, 0, True)
    out = _conv_ref(out, params["w2"], params["b2"].reshape(-1), 1, 1, True)
    out = _conv_ref(out, params["w3"], params["b3"].reshape(-1), 1, 0, False)
    return jnp.maximum(out + cut, 0.0)


# ----------------------------------------------------------------------------
# Deterministic parameter init + smoke test
# ----------------------------------------------------------------------------
def init_params(key, in_channels, bottleneck_channels, out_channels, shortcut):
    ks = jax.random.split(key, 8)
    p = {
        "w1": 0.1 * jax.random.normal(ks[0], (bottleneck_channels, in_channels, 1, 1), jnp.float32),
        "b1": 0.1 * jax.random.normal(ks[1], (1, bottleneck_channels), jnp.float32),
        "w2": 0.1 * jax.random.normal(ks[2], (bottleneck_channels, bottleneck_channels, 3, 3), jnp.float32),
        "b2": 0.1 * jax.random.normal(ks[3], (1, bottleneck_channels), jnp.float32),
        "w3": 0.1 * jax.random.normal(ks[4], (out_channels, bottleneck_channels, 1, 1), jnp.float32),
        "b3": 0.1 * jax.random.normal(ks[5], (1, out_channels), jnp.float32),
    }
    if shortcut:
        p["ws"] = 0.1 * jax.random.normal(ks[6], (out_channels, in_channels, 1, 1), jnp.float32)
        p["bs"] = 0.1 * jax.random.normal(ks[7], (1, out_channels), jnp.float32)
    return p


if __name__ == "__main__":
    key = jax.random.PRNGKey(0)
    k_x, k_p = jax.random.split(key)

    # Small shapes: batch=2, in_channels=4, spatial=16x16,
    # bottleneck_channels=8, out_channels=16, stride=2, shortcut=True.
    N, CIN, H, W = 2, 4, 16, 16
    CB, COUT, STRIDE, SHORTCUT = 8, 16, 2, True

    x = jax.random.normal(k_x, (N, CIN, H, W), jnp.float32)
    params = init_params(k_p, CIN, CB, COUT, SHORTCUT)

    # f32 operand path (exact check against the lax.conv reference).
    out = bottleneck_forward(x, params, stride=STRIDE, shortcut=SHORTCUT)
    out = jax.block_until_ready(out)
    ref = bottleneck_ref(x, params, stride=STRIDE, shortcut=SHORTCUT)
    assert out.shape == (N, COUT, H // STRIDE, W // STRIDE), out.shape
    assert jnp.allclose(out, ref, atol=1e-4, rtol=1e-4), float(jnp.max(jnp.abs(out - ref)))

    # bf16 operand path (MXU-native on v6e/v7x; f32 accumulate + f32 epilogue).
    out_bf16 = bottleneck_forward(x, params, stride=STRIDE, shortcut=SHORTCUT,
                                  compute_dtype=jnp.bfloat16)
    out_bf16 = jax.block_until_ready(out_bf16)
    assert jnp.allclose(out_bf16, ref, atol=5e-2, rtol=5e-2), \
        float(jnp.max(jnp.abs(out_bf16 - ref)))

    print("KERNEL_OK")
</pallas_src>

<mosaic_0001>
module attributes {stable_mosaic.version = 11 : i64} {
  func.func @_bottleneck_kernel(%arg0: i32, %arg1: memref<1x64x128xf32, #tpu.memory_space<vmem>>, %arg2: memref<128x128xf32, #tpu.memory_space<vmem>>, %arg3: memref<1x128xf32, #tpu.memory_space<vmem>>, %arg4: memref<9x128x128xf32, #tpu.memory_space<vmem>>, %arg5: memref<1x128xf32, #tpu.memory_space<vmem>>, %arg6: memref<128x128xf32, #tpu.memory_space<vmem>>, %arg7: memref<1x128xf32, #tpu.memory_space<vmem>>, %arg8: memref<128x128xf32, #tpu.memory_space<vmem>>, %arg9: memref<1x128xf32, #tpu.memory_space<vmem>>, %arg10: memref<1x64x128xf32, #tpu.memory_space<vmem>>, %arg11: memref<10x10x128xf32, #tpu.memory_space<vmem>>, %arg12: memref<64x128xf32, #tpu.memory_space<vmem>>) attributes {dimension_semantics = [#tpu.dimension_semantics<parallel>], iteration_bounds = array<i64: 2>, scalar_prefetch = 0 : i64, scratch_operands = 2 : i64, tpu.core_type = #tpu.core_type<tc>, window_params = [{transform_indices = @transform_0, window_bounds = array<i64: 1, 64, 128>}, {pipeline_mode = #tpu.pipeline_mode<synchronous>, transform_indices = @transform_1, window_bounds = array<i64: 128, 128>}, {pipeline_mode = #tpu.pipeline_mode<synchronous>, transform_indices = @transform_2, window_bounds = array<i64: 1, 128>}, {pipeline_mode = #tpu.pipeline_mode<synchronous>, transform_indices = @transform_3, window_bounds = array<i64: 9, 128, 128>}, {pipeline_mode = #tpu.pipeline_mode<synchronous>, transform_indices = @transform_4, window_bounds = array<i64: 1, 128>}, {pipeline_mode = #tpu.pipeline_mode<synchronous>, transform_indices = @transform_5, window_bounds = array<i64: 128, 128>}, {pipeline_mode = #tpu.pipeline_mode<synchronous>, transform_indices = @transform_6, window_bounds = array<i64: 1, 128>}, {pipeline_mode = #tpu.pipeline_mode<synchronous>, transform_indices = @transform_7, window_bounds = array<i64: 128, 128>}, {pipeline_mode = #tpu.pipeline_mode<synchronous>, transform_indices = @transform_8, window_bounds = array<i64: 1, 128>}, {transform_indices = @transform_9, window_bounds = array<i64: 1, 64, 128>}]} {
    %c0 = arith.constant 0 : index
    %c0_0 = arith.constant 0 : index
    %c0_1 = arith.constant 0 : index
    %0 = vector.load %arg1[%c0, %c0_0, %c0_1] : memref<1x64x128xf32, #tpu.memory_space<vmem>>, vector<1x64x128xf32>
    %1 = vector.shape_cast %0 : vector<1x64x128xf32> to vector<64x128xf32>
    %c0_2 = arith.constant 0 : index
    %c0_3 = arith.constant 0 : index
    %2 = vector.load %arg2[%c0_2, %c0_3] : memref<128x128xf32, #tpu.memory_space<vmem>>, vector<128x128xf32>
    %cst = arith.constant dense<0.000000e+00> : vector<64x128xf32>
    %3 = tpu.matmul %1, %2, %cst {dimension_numbers = #tpu.dot_dimension_numbers<[1], [0], [0], [1], [0, 0, 1, 1], [], []>} : vector<64x128xf32>, vector<128x128xf32>, vector<64x128xf32> -> vector<64x128xf32>
    %c0_4 = arith.constant 0 : index
    %c0_5 = arith.constant 0 : index
    %4 = vector.load %arg3[%c0_4, %c0_5] : memref<1x128xf32, #tpu.memory_space<vmem>>, vector<1x128xf32>
    %5 = vector.broadcast %4 : vector<1x128xf32> to vector<64x128xf32>
    %6 = arith.addf %3, %5 : vector<64x128xf32>
    %cst_6 = arith.constant 0.000000e+00 : f32
    %7 = vector.broadcast %cst_6 : f32 to vector<64x128xf32>
    %8 = arith.maximumf %6, %7 : vector<64x128xf32>
    %cst_7 = arith.constant 0.000000e+00 : f32
    %9 = vector.broadcast %cst_7 : f32 to vector<10x10x128xf32>
    %c0_8 = arith.constant 0 : index
    %c0_9 = arith.constant 0 : index
    %c0_10 = arith.constant 0 : index
    %10 = vector.load %arg11[%c0_8, %c0_9, %c0_10] : memref<10x10x128xf32, #tpu.memory_space<vmem>>, vector<10x10x128xf32>
    tpu.vector_store %arg11[%c0_8, %c0_9, %c0_10], %9 {strides = array<i32>} : memref<10x10x128xf32, #tpu.memory_space<vmem>>, vector<10x10x128xf32>,
    %11 = vector.shape_cast %8 : vector<64x128xf32> to vector<8x8x128xf32>
    %c1 = arith.constant 1 : index
    %c1_11 = arith.constant 1 : index
    %c0_12 = arith.constant 0 : index
    %12 = vector.load %arg11[%c1, %c1_11, %c0_12] : memref<10x10x128xf32, #tpu.memory_space<vmem>>, vector<8x8x128xf32>
    tpu.vector_store %arg11[%c1, %c1_11, %c0_12], %11 {strides = array<i32>} : memref<10x10x128xf32, #tpu.memory_space<vmem>>, vector<8x8x128xf32>,
    %cst_13 = arith.constant 0.000000e+00 : f32
    %13 = vector.broadcast %cst_13 : f32 to vector<64x128xf32>
    %c0_14 = arith.constant 0 : index
    %c0_15 = arith.constant 0 : index
    %14 = vector.load %arg12[%c0_14, %c0_15] : memref<64x128xf32, #tpu.memory_space<vmem>>, vector<64x128xf32>
    tpu.vector_store %arg12[%c0_14, %c0_15], %13 {strides = array<i32>} : memref<64x128xf32, #tpu.memory_space<vmem>>, vector<64x128xf32>,
    %c0_16 = arith.constant 0 : index
    %c0_17 = arith.constant 0 : index
    %c0_18 = arith.constant 0 : index
    %15 = vector.load %arg11[%c0_16, %c0_17, %c0_18] : memref<10x10x128xf32, #tpu.memory_space<vmem>>, vector<8x8x128xf32>
    %16 = vector.shape_cast %15 : vector<8x8x128xf32> to vector<64x128xf32>
    %c0_19 = arith.constant 0 : index
    %c0_20 = arith.constant 0 : index
    %17 = vector.load %arg12[%c0_19, %c0_20] : memref<64x128xf32, #tpu.memory_space<vmem>>, vector<64x128xf32>
    %c0_21 = arith.constant 0 : index
    %c0_22 = arith.constant 0 : index
    %c0_23 = arith.constant 0 : index
    %18 = vector.load %arg4[%c0_21, %c0_22, %c0_23] : memref<9x128x128xf32, #tpu.memory_space<vmem>>, vector<1x128x128xf32>
    %19 = vector.shape_cast %18 : vector<1x128x128xf32> to vector<128x128xf32>
    %cst_24 = arith.constant dense<0.000000e+00> : vector<64x128xf32>
    %20 = tpu.matmul %16, %19, %cst_24 {dimension_numbers = #tpu.dot_dimension_numbers<[1], [0], [0], [1], [0, 0, 1, 1], [], []>} : vector<64x128xf32>, vector<128x128xf32>, vector<64x128xf32> -> vector<64x128xf32>
    %21 = arith.addf %17, %20 : vector<64x128xf32>
    %c0_25 = arith.constant 0 : index
    %c0_26 = arith.constant 0 : index
    %22 = vector.load %arg12[%c0_25, %c0_26] : memref<64x128xf32, #tpu.memory_space<vmem>>, vector<64x128xf32>
    tpu.vector_store %arg12[%c0_25, %c0_26], %21 {strides = array<i32>} : memref<64x128xf32, #tpu.memory_space<vmem>>, vector<64x128xf32>,
    %c0_27 = arith.constant 0 : index
    %c1_28 = arith.constant 1 : index
    %c0_29 = arith.constant 0 : index
    %23 = vector.load %arg11[%c0_27, %c1_28, %c0_29] : memref<10x10x128xf32, #tpu.memory_space<vmem>>, vector<8x8x128xf32>
    %24 = vector.shape_cast %23 : vector<8x8x128xf32> to vector<64x128xf32>
    %c0_30 = arith.constant 0 : index
    %c0_31 = arith.constant 0 : index
    %25 = vector.load %arg12[%c0_30, %c0_31] : memref<64x128xf32, #tpu.memory_space<vmem>>, vector<64x128xf32>
    %c1_32 = arith.constant 1 : index
    %c0_33 = arith.constant 0 : index
    %c0_34 = arith.constant 0 : index
    %26 = vector.load %arg4[%c1_32, %c0_33, %c0_34] : memref<9x128x128xf32, #tpu.memory_space<vmem>>, vector<1x128x128xf32>
    %27 = vector.shape_cast %26 : vector<1x128x128xf32> to vector<128x128xf32>
    %cst_35 = arith.constant dense<0.000000e+00> : vector<64x128xf32>
    %28 = tpu.matmul %24, %27, %cst_35 {dimension_numbers = #tpu.dot_dimension_numbers<[1], [0], [0], [1], [0, 0, 1, 1], [], []>} : vector<64x128xf32>, vector<128x128xf32>, vector<64x128xf32> -> vector<64x128xf32>
    %29 = arith.addf %25, %28 : vector<64x128xf32>
    %c0_36 = arith.constant 0 : index
    %c0_37 = arith.constant 0 : index
    %30 = vector.load %arg12[%c0_36, %c0_37] : memref<64x128xf32, #tpu.memory_space<vmem>>, vector<64x128xf32>
    tpu.vector_store %arg12[%c0_36, %c0_37], %29 {strides = array<i32>} : memref<64x128xf32, #tpu.memory_space<vmem>>, vector<64x128xf32>,
    %c0_38 = arith.constant 0 : index
    %c2 = arith.constant 2 : index
    %c0_39 = arith.constant 0 : index
    %31 = vector.load %arg11[%c0_38, %c2, %c0_39] : memref<10x10x128xf32, #tpu.memory_space<vmem>>, vector<8x8x128xf32>
    %32 = vector.shape_cast %31 : vector<8x8x128xf32> to vector<64x128xf32>
    %c0_40 = arith.constant 0 : index
    %c0_41 = arith.constant 0 : index
    %33 = vector.load %arg12[%c0_40, %c0_41] : memref<64x128xf32, #tpu.memory_space<vmem>>, vector<64x128xf32>
    %c2_42 = arith.constant 2 : index
    %c0_43 = arith.constant 0 : index
    %c0_44 = arith.constant 0 : index
    %34 = vector.load %arg4[%c2_42, %c0_43, %c0_44] : memref<9x128x128xf32, #tpu.memory_space<vmem>>, vector<1x128x128xf32>
    %35 = vector.shape_cast %34 : vector<1x128x128xf32> to vector<128x128xf32>
    %cst_45 = arith.constant dense<0.000000e+00> : vector<64x128xf32>
    %36 = tpu.matmul %32, %35, %cst_45 {dimension_numbers = #tpu.dot_dimension_numbers<[1], [0], [0], [1], [0, 0, 1, 1], [], []>} : vector<64x128xf32>, vector<128x128xf32>, vector<64x128xf32> -> vector<64x128xf32>
    %37 = arith.addf %33, %36 : vector<64x128xf32>
    %c0_46 = arith.constant 0 : index
    %c0_47 = arith.constant 0 : index
    %38 = vector.load %arg12[%c0_46, %c0_47] : memref<64x128xf32, #tpu.memory_space<vmem>>, vector<64x128xf32>
    tpu.vector_store %arg12[%c0_46, %c0_47], %37 {strides = array<i32>} : memref<64x128xf32, #tpu.memory_space<vmem>>, vector<64x128xf32>,
    %c1_48 = arith.constant 1 : index
    %c0_49 = arith.constant 0 : index
    %c0_50 = arith.constant 0 : index
    %39 = vector.load %arg11[%c1_48, %c0_49, %c0_50] : memref<10x10x128xf32, #tpu.memory_space<vmem>>, vector<8x8x128xf32>
    %40 = vector.shape_cast %39 : vector<8x8x128xf32> to vector<64x128xf32>
    %c0_51 = arith.constant 0 : index
    %c0_52 = arith.constant 0 : index
    %41 = vector.load %arg12[%c0_51, %c0_52] : memref<64x128xf32, #tpu.memory_space<vmem>>, vector<64x128xf32>
    %c3 = arith.constant 3 : index
    %c0_53 = arith.constant 0 : index
    %c0_54 = arith.constant 0 : index
    %42 = vector.load %arg4[%c3, %c0_53, %c0_54] : memref<9x128x128xf32, #tpu.memory_space<vmem>>, vector<1x128x128xf32>
    %43 = vector.shape_cast %42 : vector<1x128x128xf32> to vector<128x128xf32>
    %cst_55 = arith.constant dense<0.000000e+00> : vector<64x128xf32>
    %44 = tpu.matmul %40, %43, %cst_55 {dimension_numbers = #tpu.dot_dimension_numbers<[1], [0], [0], [1], [0, 0, 1, 1], [], []>} : vector<64x128xf32>, vector<128x128xf32>, vector<64x128xf32> -> vector<64x128xf32>
    %45 = arith.addf %41, %44 : vector<64x128xf32>
    %c0_56 = arith.constant 0 : index
    %c0_57 = arith.constant 0 : index
    %46 = vector.load %arg12[%c0_56, %c0_57] : memref<64x128xf32, #tpu.memory_space<vmem>>, vector<64x128xf32>
    tpu.vector_store %arg12[%c0_56, %c0_57], %45 {strides = array<i32>} : memref<64x128xf32, #tpu.memory_space<vmem>>, vector<64x128xf32>,
    %c1_58 = arith.constant 1 : index
    %c1_59 = arith.constant 1 : index
    %c0_60 = arith.constant 0 : index
    %47 = vector.load %arg11[%c1_58, %c1_59, %c0_60] : memref<10x10x128xf32, #tpu.memory_space<vmem>>, vector<8x8x128xf32>
    %48 = vector.shape_cast %47 : vector<8x8x128xf32> to vector<64x128xf32>
    %c0_61 = arith.constant 0 : index
    %c0_62 = arith.constant 0 : index
    %49 = vector.load %arg12[%c0_61, %c0_62] : memref<64x128xf32, #tpu.memory_space<vmem>>, vector<64x128xf32>
    %c4 = arith.constant 4 : index
    %c0_63 = arith.constant 0 : index
    %c0_64 = arith.constant 0 : index
    %50 = vector.load %arg4[%c4, %c0_63, %c0_64] : memref<9x128x128xf32, #tpu.memory_space<vmem>>, vector<1x128x128xf32>
    %51 = vector.shape_cast %50 : vector<1x128x128xf32> to vector<128x128xf32>
    %cst_65 = arith.constant dense<0.000000e+00> : vector<64x128xf32>
    %52 = tpu.matmul %48, %51, %cst_65 {dimension_numbers = #tpu.dot_dimension_numbers<[1], [0], [0], [1], [0, 0, 1, 1], [], []>} : vector<64x128xf32>, vector<128x128xf32>, vector<64x128xf32> -> vector<64x128xf32>
    %53 = arith.addf %49, %52 : vector<64x128xf32>
    %c0_66 = arith.constant 0 : index
    %c0_67 = arith.constant 0 : index
    %54 = vector.load %arg12[%c0_66, %c0_67] : memref<64x128xf32, #tpu.memory_space<vmem>>, vector<64x128xf32>
    tpu.vector_store %arg12[%c0_66, %c0_67], %53 {strides = array<i32>} : memref<64x128xf32, #tpu.memory_space<vmem>>, vector<64x128xf32>,
    %c1_68 = arith.constant 1 : index
    %c2_69 = arith.constant 2 : index
    %c0_70 = arith.constant 0 : index
    %55 = vector.load %arg11[%c1_68, %c2_69, %c0_70] : memref<10x10x128xf32, #tpu.memory_space<vmem>>, vector<8x8x128xf32>
    %56 = vector.shape_cast %55 : vector<8x8x128xf32> to vector<64x128xf32>
    %c0_71 = arith.constant 0 : index
    %c0_72 = arith.constant 0 : index
    %57 = vector.load %arg12[%c0_71, %c0_72] : memref<64x128xf32, #tpu.memory_space<vmem>>, vector<64x128xf32>
    %c5 = arith.constant 5 : index
    %c0_73 = arith.constant 0 : index
    %c0_74 = arith.constant 0 : index
    %58 = vector.load %arg4[%c5, %c0_73, %c0_74] : memref<9x128x128xf32, #tpu.memory_space<vmem>>, vector<1x128x128xf32>
    %59 = vector.shape_cast %58 : vector<1x128x128xf32> to vector<128x128xf32>
    %cst_75 = arith.constant dense<0.000000e+00> : vector<64x128xf32>
    %60 = tpu.matmul %56, %59, %cst_75 {dimension_numbers = #tpu.dot_dimension_numbers<[1], [0], [0], [1], [0, 0, 1, 1], [], []>} : vector<64x128xf32>, vector<128x128xf32>, vector<64x128xf32> -> vector<64x128xf32>
    %61 = arith.addf %57, %60 : vector<64x128xf32>
    %c0_76 = arith.constant 0 : index
    %c0_77 = arith.constant 0 : index
    %62 = vector.load %arg12[%c0_76, %c0_77] : memref<64x128xf32, #tpu.memory_space<vmem>>, vector<64x128xf32>
    tpu.vector_store %arg12[%c0_76, %c0_77], %61 {strides = array<i32>} : memref<64x128xf32, #tpu.memory_space<vmem>>, vector<64x128xf32>,
    %c2_78 = arith.constant 2 : index
    %c0_79 = arith.constant 0 : index
    %c0_80 = arith.constant 0 : index
    %63 = vector.load %arg11[%c2_78, %c0_79, %c0_80] : memref<10x10x128xf32, #tpu.memory_space<vmem>>, vector<8x8x128xf32>
    %64 = vector.shape_cast %63 : vector<8x8x128xf32> to vector<64x128xf32>
    %c0_81 = arith.constant 0 : index
    %c0_82 = arith.constant 0 : index
    %65 = vector.load %arg12[%c0_81, %c0_82] : memref<64x128xf32, #tpu.memory_space<vmem>>, vector<64x128xf32>
    %c6 = arith.constant 6 : index
    %c0_83 = arith.constant 0 : index
    %c0_84 = arith.constant 0 : index
    %66 = vector.load %arg4[%c6, %c0_83, %c0_84] : memref<9x128x128xf32, #tpu.memory_space<vmem>>, vector<1x128x128xf32>
    %67 = vector.shape_cast %66 : vector<1x128x128xf32> to vector<128x128xf32>
    %cst_85 = arith.constant dense<0.000000e+00> : vector<64x128xf32>
    %68 = tpu.matmul %64, %67, %cst_85 {dimension_numbers = #tpu.dot_dimension_numbers<[1], [0], [0], [1], [0, 0, 1, 1], [], []>} : vector<64x128xf32>, vector<128x128xf32>, vector<64x128xf32> -> vector<64x128xf32>
    %69 = arith.addf %65, %68 : vector<64x128xf32>
    %c0_86 = arith.constant 0 : index
    %c0_87 = arith.constant 0 : index
    %70 = vector.load %arg12[%c0_86, %c0_87] : memref<64x128xf32, #tpu.memory_space<vmem>>, vector<64x128xf32>
    tpu.vector_store %arg12[%c0_86, %c0_87], %69 {strides = array<i32>} : memref<64x128xf32, #tpu.memory_space<vmem>>, vector<64x128xf32>,
    %c2_88 = arith.constant 2 : index
    %c1_89 = arith.constant 1 : index
    %c0_90 = arith.constant 0 : index
    %71 = vector.load %arg11[%c2_88, %c1_89, %c0_90] : memref<10x10x128xf32, #tpu.memory_space<vmem>>, vector<8x8x128xf32>
    %72 = vector.shape_cast %71 : vector<8x8x128xf32> to vector<64x128xf32>
    %c0_91 = arith.constant 0 : index
    %c0_92 = arith.constant 0 : index
    %73 = vector.load %arg12[%c0_91, %c0_92] : memref<64x128xf32, #tpu.memory_space<vmem>>, vector<64x128xf32>
    %c7 = arith.constant 7 : index
    %c0_93 = arith.constant 0 : index
    %c0_94 = arith.constant 0 : index
    %74 = vector.load %arg4[%c7, %c0_93, %c0_94] : memref<9x128x128xf32, #tpu.memory_space<vmem>>, vector<1x128x128xf32>
    %75 = vector.shape_cast %74 : vector<1x128x128xf32> to vector<128x128xf32>
    %cst_95 = arith.constant dense<0.000000e+00> : vector<64x128xf32>
    %76 = tpu.matmul %72, %75, %cst_95 {dimension_numbers = #tpu.dot_dimension_numbers<[1], [0], [0], [1], [0, 0, 1, 1], [], []>} : vector<64x128xf32>, vector<128x128xf32>, vector<64x128xf32> -> vector<64x128xf32>
    %77 = arith.addf %73, %76 : vector<64x128xf32>
    %c0_96 = arith.constant 0 : index
    %c0_97 = arith.constant 0 : index
    %78 = vector.load %arg12[%c0_96, %c0_97] : memref<64x128xf32, #tpu.memory_space<vmem>>, vector<64x128xf32>
    tpu.vector_store %arg12[%c0_96, %c0_97], %77 {strides = array<i32>} : memref<64x128xf32, #tpu.memory_space<vmem>>, vector<64x128xf32>,
    %c2_98 = arith.constant 2 : index
    %c2_99 = arith.constant 2 : index
    %c0_100 = arith.constant 0 : index
    %79 = vector.load %arg11[%c2_98, %c2_99, %c0_100] : memref<10x10x128xf32, #tpu.memory_space<vmem>>, vector<8x8x128xf32>
    %80 = vector.shape_cast %79 : vector<8x8x128xf32> to vector<64x128xf32>
    %c0_101 = arith.constant 0 : index
    %c0_102 = arith.constant 0 : index
    %81 = vector.load %arg12[%c0_101, %c0_102] : memref<64x128xf32, #tpu.memory_space<vmem>>, vector<64x128xf32>
    %c8 = arith.constant 8 : index
    %c0_103 = arith.constant 0 : index
    %c0_104 = arith.constant 0 : index
    %82 = vector.load %arg4[%c8, %c0_103, %c0_104] : memref<9x128x128xf32, #tpu.memory_space<vmem>>, vector<1x128x128xf32>
    %83 = vector.shape_cast %82 : vector<1x128x128xf32> to vector<128x128xf32>
    %cst_105 = arith.constant dense<0.000000e+00> : vector<64x128xf32>
    %84 = tpu.matmul %80, %83, %cst_105 {dimension_numbers = #tpu.dot_dimension_numbers<[1], [0], [0], [1], [0, 0, 1, 1], [], []>} : vector<64x128xf32>, vector<128x128xf32>, vector<64x128xf32> -> vector<64x128xf32>
    %85 = arith.addf %81, %84 : vector<64x128xf32>
    %c0_106 = arith.constant 0 : index
    %c0_107 = arith.constant 0 : index
    %86 = vector.load %arg12[%c0_106, %c0_107] : memref<64x128xf32, #tpu.memory_space<vmem>>, vector<64x128xf32>
    tpu.vector_store %arg12[%c0_106, %c0_107], %85 {strides = array<i32>} : memref<64x128xf32, #tpu.memory_space<vmem>>, vector<64x128xf32>,
    %c0_108 = arith.constant 0 : index
    %c0_109 = arith.constant 0 : index
    %87 = vector.load %arg12[%c0_108, %c0_109] : memref<64x128xf32, #tpu.memory_space<vmem>>, vector<64x128xf32>
    %c0_110 = arith.constant 0 : index
    %c0_111 = arith.constant 0 : index
    %88 = vector.load %arg5[%c0_110, %c0_111] : memref<1x128xf32, #tpu.memory_space<vmem>>, vector<1x128xf32>
    %89 = vector.broadcast %88 : vector<1x128xf32> to vector<64x128xf32>
    %90 = arith.addf %87, %89 : vector<64x128xf32>
    %cst_112 = arith.constant 0.000000e+00 : f32
    %91 = vector.broadcast %cst_112 : f32 to vector<64x128xf32>
    %92 = arith.maximumf %90, %91 : vector<64x128xf32>
    %c0_113 = arith.constant 0 : index
    %c0_114 = arith.constant 0 : index
    %93 = vector.load %arg6[%c0_113, %c0_114] : memref<128x128xf32, #tpu.memory_space<vmem>>, vector<128x128xf32>
    %cst_115 = arith.constant dense<0.000000e+00> : vector<64x128xf32>
    %94 = tpu.matmul %92, %93, %cst_115 {dimension_numbers = #tpu.dot_dimension_numbers<[1], [0], [0], [1], [0, 0, 1, 1], [], []>} : vector<64x128xf32>, vector<128x128xf32>, vector<64x128xf32> -> vector<64x128xf32>
    %c0_116 = arith.constant 0 : index
    %c0_117 = arith.constant 0 : index
    %95 = vector.load %arg7[%c0_116, %c0_117] : memref<1x128xf32, #tpu.memory_space<vmem>>, vector<1x128xf32>
    %96 = vector.broadcast %95 : vector<1x128xf32> to vector<64x128xf32>
    %97 = arith.addf %94, %96 : vector<64x128xf32>
    %c0_118 = arith.constant 0 : index
    %c0_119 = arith.constant 0 : index
    %98 = vector.load %arg8[%c0_118, %c0_119] : memref<128x128xf32, #tpu.memory_space<vmem>>, vector<128x128xf32>
    %cst_120 = arith.constant dense<0.000000e+00> : vector<64x128xf32>
    %99 = tpu.matmul %1, %98, %cst_120 {dimension_numbers = #tpu.dot_dimension_numbers<[1], [0], [0], [1], [0, 0, 1, 1], [], []>} : vector<64x128xf32>, vector<128x128xf32>, vector<64x128xf32> -> vector<64x128xf32>
    %c0_121 = arith.constant 0 : index
    %c0_122 = arith.constant 0 : index
    %100 = vector.load %arg9[%c0_121, %c0_122] : memref<1x128xf32, #tpu.memory_space<vmem>>, vector<1x128xf32>
    %101 = vector.broadcast %100 : vector<1x128xf32> to vector<64x128xf32>
    %102 = arith.addf %99, %101 : vector<64x128xf32>
    %103 = arith.addf %97, %102 : vector<64x128xf32>
    %cst_123 = arith.constant 0.000000e+00 : f32
    %104 = vector.broadcast %cst_123 : f32 to vector<64x128xf32>
    %105 = arith.maximumf %103, %104 : vector<64x128xf32>
    %106 = vector.shape_cast %105 : vector<64x128xf32> to vector<1x64x128xf32>
    %c0_124 = arith.constant 0 : index
    %c0_125 = arith.constant 0 : index
    %c0_126 = arith.constant 0 : index
    %107 = vector.load %arg10[%c0_124, %c0_125, %c0_126] : memref<1x64x128xf32, #tpu.memory_space<vmem>>, vector<1x64x128xf32>
    tpu.vector_store %arg10[%c0_124, %c0_125, %c0_126], %106 {strides = array<i32>} : memref<1x64x128xf32, #tpu.memory_space<vmem>>, vector<1x64x128xf32>,
    return
  }
  func.func @transform_0(%arg0: i32) -> (i32, i32, i32) {
    %c0_i32 = arith.constant 0 : i32
    %c0_i32_0 = arith.constant 0 : i32
    %c0_i32_1 = arith.constant 0 : i32
    return %arg0, %c0_i32, %c0_i32_0 : i32, i32, i32
  }
  func.func @transform_1(%arg0: i32) -> (i32, i32) {
    %c0_i32 = arith.constant 0 : i32
    %c0_i32_0 = arith.constant 0 : i32
    %c0_i32_1 = arith.constant 0 : i32
    return %c0_i32, %c0_i32_0 : i32, i32
  }
  func.func @transform_2(%arg0: i32) -> (i32, i32) {
    %c0_i32 = arith.constant 0 : i32
    %c0_i32_0 = arith.constant 0 : i32
    %c0_i32_1 = arith.constant 0 : i32
    return %c0_i32, %c0_i32_0 : i32, i32
  }
  func.func @transform_3(%arg0: i32) -> (i32, i32, i32) {
    %c0_i32 = arith.constant 0 : i32
    %c0_i32_0 = arith.constant 0 : i32
    %c0_i32_1 = arith.constant 0 : i32
    %c0_i32_2 = arith.constant 0 : i32
    return %c0_i32, %c0_i32_0, %c0_i32_1 : i32, i32, i32
  }
  func.func @transform_4(%arg0: i32) -> (i32, i32) {
    %c0_i32 = arith.constant 0 : i32
    %c0_i32_0 = arith.constant 0 : i32
    %c0_i32_1 = arith.constant 0 : i32
    return %c0_i32, %c0_i32_0 : i32, i32
  }
  func.func @transform_5(%arg0: i32) -> (i32, i32) {
    %c0_i32 = arith.constant 0 : i32
    %c0_i32_0 = arith.constant 0 : i32
    %c0_i32_1 = arith.constant 0 : i32
    return %c0_i32, %c0_i32_0 : i32, i32
  }
  func.func @transform_6(%arg0: i32) -> (i32, i32) {
    %c0_i32 = arith.constant 0 : i32
    %c0_i32_0 = arith.constant 0 : i32
    %c0_i32_1 = arith.constant 0 : i32
    return %c0_i32, %c0_i32_0 : i32, i32
  }
  func.func @transform_7(%arg0: i32) -> (i32, i32) {
    %c0_i32 = arith.constant 0 : i32
    %c0_i32_0 = arith.constant 0 : i32
    %c0_i32_1 = arith.constant 0 : i32
    return %c0_i32, %c0_i32_0 : i32, i32
  }
  func.func @transform_8(%arg0: i32) -> (i32, i32) {
    %c0_i32 = arith.constant 0 : i32
    %c0_i32_0 = arith.constant 0 : i32
    %c0_i32_1 = arith.constant 0 : i32
    return %c0_i32, %c0_i32_0 : i32, i32
  }
  func.func @transform_9(%arg0: i32) -> (i32, i32, i32) {
    %c0_i32 = arith.constant 0 : i32
    %c0_i32_0 = arith.constant 0 : i32
    %c0_i32_1 = arith.constant 0 : i32
    return %arg0, %c0_i32, %c0_i32_0 : i32, i32, i32
  }
}

</mosaic_0001>

<bundles_post_ra>
// kernel: tpu_custom_call.1
= control target key start
LH: loop header
LB: loop body
LE: loop exit
PB: predicated region body
PF: predicated region fallthrough
CT: control target
= control target key end

     0   :  { %s4569_s0 = inlined_call_operand.hbm [shape: f32[2,64,128], index: 0, kind: input, shape index: {}]   ;;  %s4570_s1 = inlined_call_operand.hbm [shape: f32[128,128], index: 1, kind: input, shape index: {}]   ;;  %s4571_s2 = inlined_call_operand.vmem [shape: f32[1,128], index: 2, kind: input, shape index: {}]   ;;  %s4572_s3 = inlined_call_operand.hbm [shape: f32[9,128,128], index: 3, kind: input, shape index: {}]   ;;  %s4573_s4 = inlined_call_operand.vmem [shape: f32[1,128], index: 4, kind: input, shape index: {}]   ;;  %s4574_s5 = inlined_call_operand.hbm [shape: f32[128,128], index: 5, kind: input, shape index: {}]   ;;  %s4575_s6 = inlined_call_operand.vmem [shape: f32[1,128], index: 6, kind: input, shape index: {}]   ;;  %s4576_s7 = inlined_call_operand.hbm [shape: f32[128,128], index: 7, kind: input, shape index: {}]   ;;  %s4577_s8 = inlined_call_operand.vmem [shape: f32[1,128], index: 8, kind: input, shape index: {}]   ;;  %s4578_s9 = inlined_call_operand.hbm [shape: f32[2,64,128], index: 9, kind: output, shape index: {}]  }
   0x1   :  { %4585 = sst [smem:[#allocation20_spill]] %s4578_s9 }
   0x2   :  { %14 = vsyncpa [#allocation5], 0 }
   0x3   :  { %16 = vsyncpa [#allocation5 + $0x1], 0 }
   0x4   :  { %17 = vsyncpa [#allocation8], 0 }
   0x5   :  { %18 = vsyncpa [#allocation11], 0 }
   0x6   :  { %19 = vsyncpa [#allocation6], 0 }
   0x7   :  { %21 = vsyncpa [#allocation6 + $0x1], 0  ;;  %s4107_s30 = smov 0   ;;  %s4109_s10 = smov 0  }
   0x8   :  { %s4111_s11 = smov 0   ;;  %s4113_s12 = smov 0  }
   0x9 LB: > { %4586 = sst [smem:[#allocation18_spill]] %s4032_s30  ;;  %s4128_s13 = sadd.s32 4294967295, %s4044_s12   ;;  %s4044_s12 = sphi %s4113_s12, %s4610_s12   ;;  %s4040_s11 = sphi %s4111_s11, %s4609_s11   ;;  %s4036_s10 = sphi %s4109_s10, %s4608_s10   ;;  %s4032_s30 = sphi %s4107_s30, %s4607_s30  }
   0xa   : > { %s2412_s14 = sadd.s32 4294967294, %s4044_s12   ;;  %p47_p0 = scmp.ne.s32.totalorder %s4036_s10, %s4032_s30 }
   0xb   : > { %p4579_p1 = scmp.eq.s32.totalorder %s4128_s13, 0  ;;  %p245_p3 = scmp.eq.s32.totalorder %s2412_s14, 1 }
   0xc   : > { %p2413_p5 = scmp.ge.s32.totalorder %s4044_s12, 1  ;;  %p252_p7 = scmp.lt.s32.totalorder %s4044_s12, 3 }
   0xd   : > { %p4137_p4 = por %p4579_p1, %p47_p0  ;;  %p4142_p6 = por %p245_p3, %p47_p0 }
   0xe   : > { %p4147_p8 = pnand %p2413_p5, %p252_p7  ;;  %s4046_s18 = smov [#allocation7]  }
   0xf   : > { %s4587_s15 = scalar_select %p4137_p4, 1, 0 }
  0x10   : > { %s4588_s16 = scalar_select %p4142_p6, 1, 0 }
  0x11   : > { %s4590_s17 = scalar_select %p4147_p8, 1, 0 }
  0x12   : > { %4589 = sst [smem:[#allocation19_spill]] %s4588_s16  ;;  %s264_s19 = sshll.u32 %s4046_s18, 4  ;;  %s4151_s19 = int_to_ptr.vmem [resolvable:$true] %s264_s19 }
  0x13   : > { %p3748_p9 = pneg %p4147_p8  ;;  %s4047_s21 = smov [#allocation10]  }
  0x14   : > { %s296_s22 = sshll.u32 %s4047_s21, 4  ;;  %s4048_s23 = smov [#allocation9]   ;;  %s4162_s22 = int_to_ptr.vmem [resolvable:$true] %s296_s22 }
  0x15   : > { %p4158_p11 = pnand %p3748_p9, %p4579_p1  ;;  %s4164_s24 = sshll.u32 %s4048_s23, 4  ;;  %s281_s24 = int_to_ptr.vmem [resolvable:$true] %s4164_s24 }
  0x16   : > { %s3828_s27 = scalar_lea.hbm %s4570_s1, 2048 }
  0x17   : > { %p3829_p12 = scmp.ne.s32.totalorder %s4570_s1, %s3828_s27  ;;  %p4174_p13 = pneg %p4158_p11 }
  0x18   : > { %p3835_p5 = scmp.lt.u32.totalorder %s3828_s27, %s4570_s1 }
  0x19   : > { %p3831_p0 = pnand %p4174_p13, %p3829_p12 }
  0x1b   : > { %p3832_p3 = pneg %p3831_p0 }
  0x1d   : > { %p3837_p7 = pnand %p3835_p5, %p3832_p3 }
  0x1f   : > { %3840 = shalt.err (!%p3837_p7)
}
  0x20   : > { %s3841_s23 = scalar_lea.vmem %s4151_s19, 2048  ;;  %p3849_p2 = scmp.lt.s32.totalorder %s4151_s19, %s4151_s19 }
  0x21   : > { %p3842_p9 = scmp.ne.s32.totalorder %s4151_s19, %s3841_s23  ;;  %p3850_p6 = scmp.lt.s32.totalorder %s3841_s23, %s3841_s23 }
  0x23   : > { %p3844_p10 = pnand %p3842_p9, %p4174_p13  ;;  %p3851_p12 = por %p3850_p6, %p3849_p2 }
  0x25   : > { %p3845_p1 = pneg %p3844_p10 }
  0x27   : > { %p3852_p0 = pnand %p3851_p12, %p3845_p1 }
  0x29   : > { %3855 = shalt.err (!%p3852_p0)
}
  0x2a   : > { %s4049_s25 = smov 128   ;;  %s4050_s26 = smov 8  }
  0x2b   : > { %3751 = dma.hbm_to_vmem [thread:$0]  (!%p4158_p11), %s4570_s1, 2048, %s4151_s19, [#allocation8], %s4049_s25, %s4049_s25, %s4050_s26  }
  0x2c   : > { %s3856_s21 = scalar_lea.hbm %s4574_s5, 2048 }
  0x2d   : > { %p3857_p1 = scmp.ne.s32.totalorder %s4574_s5, %s3856_s21  ;;  %p3863_p10 = scmp.lt.u32.totalorder %s3856_s21, %s4574_s5 }
  0x2f   : > { %p3859_p2 = pnand %p3857_p1, %p4174_p13 }
  0x31   : > { %p3860_p6 = pneg %p3859_p2 }
  0x33   : > { %p3865_p3 = pnand %p3863_p10, %p3860_p6 }
  0x35   : > { %3868 = shalt.err (!%p3865_p3)
}
  0x36   : > { %s3869_s19 = scalar_lea.vmem %s4162_s22, 2048  ;;  %p3877_p12 = scmp.lt.s32.totalorder %s4162_s22, %s4162_s22 }
  0x37   : > { %p3870_p5 = scmp.ne.s32.totalorder %s4162_s22, %s3869_s19  ;;  %p3878_p0 = scmp.lt.s32.totalorder %s3869_s19, %s3869_s19 }
  0x39   : > { %p3872_p7 = pnand %p3870_p5, %p4174_p13  ;;  %p3879_p1 = por %p3878_p0, %p3877_p12 }
  0x3b   : > { %p3873_p9 = pneg %p3872_p7 }
  0x3d   : > { %p3880_p2 = pnand %p3879_p1, %p3873_p9 }
  0x3f   : > { %3883 = shalt.err (!%p3880_p2)
}
  0x40   : > { %3757 = dma.hbm_to_vmem [thread:$0]  (!%p4158_p11), %s4574_s5, 2048, %s4162_s22, [#allocation11], %s4049_s25, %s4049_s25, %s4050_s26  }
  0x41   : > { %s3884_s28 = scalar_lea.hbm %s4572_s3, 18432 }
  0x42   : > { %p3885_p6 = scmp.ne.s32.totalorder %s4572_s3, %s3884_s28  ;;  %p3891_p5 = scmp.lt.u32.totalorder %s3884_s28, %s4572_s3 }
  0x44   : > { %p3887_p10 = pnand %p3885_p6, %p4174_p13 }
  0x46   : > { %p3888_p3 = pneg %p3887_p10 }
  0x48   : > { %p3893_p7 = pnand %p3891_p5, %p3888_p3 }
  0x4a   : > { %3896 = shalt.err (!%p3893_p7)
}
  0x4b   : > { %s3897_s19 = scalar_lea.vmem %s281_s24, 18432  ;;  %p3905_p1 = scmp.lt.s32.totalorder %s281_s24, %s281_s24 }
  0x4c   : > { %p3898_p9 = scmp.ne.s32.totalorder %s281_s24, %s3897_s19  ;;  %p3906_p2 = scmp.lt.s32.totalorder %s3897_s19, %s3897_s19 }
  0x4e   : > { %p3900_p12 = pnand %p3898_p9, %p4174_p13  ;;  %p3907_p4 = por %p3906_p2, %p3905_p1 }
  0x50   : > { %p3901_p0 = pneg %p3900_p12 }
  0x52   : > { %p3908_p8 = pnand %p3907_p4, %p3901_p0 }
  0x54   : > { %3911 = shalt.err (!%p3908_p8)
}
  0x55   : > { %3754 = dma.hbm_to_vmem [thread:$0]  (!%p4158_p11), %s4572_s3, 18432, %s281_s24, [#allocation8], %s4049_s25, %s4049_s25, %s4050_s26  }
  0x56   : > { %s4051_s30 = smov [#allocation12]   ;;  %s3912_s29 = scalar_lea.hbm %s4576_s7, 2048 }
  0x57   : > { %s312_s16 = sshll.u32 %s4051_s30, 4  ;;  %p3913_p4 = scmp.ne.s32.totalorder %s4576_s7, %s3912_s29  ;;  %s313_s16 = int_to_ptr.vmem [resolvable:$true] %s312_s16 }
  0x58   : > { %p3919_p10 = scmp.lt.u32.totalorder %s3912_s29, %s4576_s7 }
  0x59   : > { %p3915_p8 = pnand %p3913_p4, %p4174_p13 }
  0x5b   : > { %p3916_p6 = pneg %p3915_p8 }
  0x5d   : > { %p3921_p3 = pnand %p3919_p10, %p3916_p6 }
  0x5f   : > { %3924 = shalt.err (!%p3921_p3)
}
  0x60   : > { %s3925_s24 = scalar_lea.vmem %s313_s16, 2048  ;;  %p3933_p12 = scmp.lt.s32.totalorder %s313_s16, %s313_s16 }
  0x61   : > { %p3926_p5 = scmp.ne.s32.totalorder %s313_s16, %s3925_s24  ;;  %p3934_p0 = scmp.lt.s32.totalorder %s3925_s24, %s3925_s24 }
  0x63   : > { %p3928_p7 = pnand %p3926_p5, %p4174_p13  ;;  %p3935_p1 = por %p3934_p0, %p3933_p12 }
  0x65   : > { %p3929_p9 = pneg %p3928_p7 }
  0x67   : > { %p3936_p2 = pnand %p3935_p1, %p3929_p9 }
  0x69   : > { %3939 = shalt.err (!%p3936_p2)
}
  0x6a   : > { %3760 = dma.hbm_to_vmem [thread:$0]  (!%p4158_p11), %s4576_s7, 2048, %s313_s16, [#allocation11], %s4049_s25, %s4049_s25, %s4050_s26  }
  0x6b   : > { %s4268_s14 = sadd.s32 1, %s4044_s12   ;;  %s34_s20 = sadd.s32 1, %s4040_s11 }
  0x6c   : > { %s31_s30 = ssub.s32 %s4044_s12, %s4268_s14  ;;  %p41_p13 = scmp.ne.s32.totalorder %s4040_s11, %s4036_s10 }
  0x6d   : > { %p32_p4 = scmp.eq.s32.totalorder %s31_s30, 0  ;;  %p42_p8 = scmp.eq.s32.totalorder %s4044_s12, 0 }
  0x6e   : > { %p4593_p6 = scmp.eq.s32.totalorder %s4128_s13, 1  ;;  %p3773_p3 = scmp.lt.s32.totalorder %s4044_s12, 2 }
  0x6f   : > { %s4284_s28 = scalar_select %p32_p4, %s4040_s11, %s34_s20  }
  0x70   : > { %p4278_p10 = por %p4593_p6, %p41_p13  ;;  %p43_p5 = por %p42_p8, %p41_p13 }
  0x71   : > { %s329_s29 = sand.u32 1, %s4040_s11   ;;  %s2438_s16 = sshll.u32 %s4044_s12, 10 }
  0x72   : > { %s2419_s18 = sshll.u32 %s329_s29, 6  ;;  %s4291_s19 = scalar_lea.hbm %s4569_s0, %s2438_s16 }
  0x73   : > { %s333_s24 = scalar_lea.vmem [#allocation4], %s2419_s18  ;;  %p4295_p11 = pnand %p3773_p3, %p43_p5 }
  0x74   : > { %s340_s22 = sshll.u32 %s333_s24, 4  ;;  %s4299_s20 = scalar_lea.sflag [#allocation5], %s329_s29  ;;  %s4293_s22 = int_to_ptr.vmem [resolvable:$true] %s340_s22 }
  0x75   : > { %s3940_s30 = scalar_lea.hbm %s4291_s19, 1024  ;;  %p3942_p9 = pneg %p4295_p11 }
  0x76   : > { %p3941_p7 = scmp.ne.s32.totalorder %s4291_s19, %s3940_s30  ;;  %s3945_s21 = scalar_lea.hbm %s4569_s0, 2048 }
  0x77   : > { %p3946_p1 = scmp.lt.u32.totalorder %s4291_s19, %s4569_s0  ;;  %p3947_p2 = scmp.lt.u32.totalorder %s3945_s21, %s3940_s30 }
  0x78   : > { %p3943_p12 = pnand %p3942_p9, %p3941_p7  ;;  %p3949_p4 = scmp.lt.u32.totalorder %s3940_s30, %s4291_s19 }
  0x79   : > { %p3948_p13 = por %p3947_p2, %p3946_p1 }
  0x7a   : > { %p3944_p0 = pneg %p3943_p12 }
  0x7b   : > { %p3950_p8 = por %p3949_p4, %p3948_p13 }
  0x7d   : > { %p3951_p6 = pnand %p3950_p8, %p3944_p0 }
  0x7f   : > { %3954 = shalt.err (!%p3951_p6)
}
  0x80   : > { %s3955_s29 = scalar_lea.vmem %s4293_s22, 1024  ;;  %s4052_s18 = smov [#allocation4]  }
  0x81   : > { %p3956_p3 = scmp.ne.s32.totalorder %s4293_s22, %s3955_s29  ;;  %s3960_s16 = sshll.u32 %s4052_s18, 4  ;;  %s3961_s16 = int_to_ptr.vmem [resolvable:$false] %s3960_s16 }
  0x82   : > { %s3962_s23 = scalar_lea.vmem %s3961_s16, 2048  ;;  %p3963_p12 = scmp.lt.s32.totalorder %s4293_s22, %s3961_s16 }
  0x83   : > { %p3958_p5 = pnand %p3956_p3, %p3942_p9  ;;  %p3964_p1 = scmp.lt.s32.totalorder %s3962_s23, %s3955_s29 }
  0x85   : > { %p3959_p7 = pneg %p3958_p5  ;;  %p3965_p2 = por %p3964_p1, %p3963_p12 }
  0x87   : > { %p3966_p13 = pnand %p3965_p2, %p3959_p7 }
  0x89   : > { %3969 = shalt.err (!%p3966_p13)
}
  0x8a   : > { %3764 = dma.hbm_to_vmem [thread:$0]  (!%p4295_p11), %s4291_s19, 1024, %s4293_s22, %s4299_s20, %s4049_s25, %s4049_s25, %s4050_s26  }
  0x8b   : > { %p4596_p9 = scmp.ne.s32.totalorder %s4590_s17, 0 }
  0x8c   : > { %s4333_s30 = sand.u32 (!%p4596_p9), 1, %s4036_s10   ;;  %p4597_p0 = scmp.ne.s32.totalorder (!%p4596_p9), %s4587_s15, 0 }
  0x8d   : > { %352 = sbr.rel (%p4596_p9) target bundleno = 1074 (0x432), region = 56  ;;  %s2423_s21 = sshll.u32 (!%p4596_p9), %s4333_s30, 6 }
  0x8e   : > { %s355_s24 = scalar_lea.sflag (!%p4596_p9), [#allocation5], %s4333_s30  ;;  %s4339_s9 = scalar_lea.vmem (!%p4596_p9), [#allocation4], %s2423_s21 }
  0x94   : > { %4015 = dma.done.wait (%p4597_p0), %s355_s24, 1024  }
  0x95   : > { %4017 = vsyncadd (%p4597_p0), %s355_s24, 4294966272  ;;  %p4598_p11 = scmp.eq.s32.totalorder %s4128_s13, 0 }
  0x97   : > { %4019 = dma.done.wait (%p4598_p11), [#allocation8], 20480   ;;  %p4599_p4 = pmov %p4598_p11 }
  0x99   : > { %4021 = vsyncadd (%p4599_p4), [#allocation8], 4294946816  ;;  %p4600_p8 = pmov %p4599_p4 }
  0x9a   : > { %p4601_p6 = pmov %p4599_p4 }
  0x9b   : > { %4023 = dma.done.wait (%p4600_p8), [#allocation11], 4096  }
  0x9c   : > { %4025 = vsyncadd (%p4601_p6), [#allocation11], 4294963200  ;;  %v417_v0 = vld [vmem:[#allocation7] sm:$0xff]  ;;  %v418_v1 = vld [vmem:[#allocation7 + $0x8] sm:$0xff]  ;;  %s408_s18 = scalar_lea.vmem [#allocation13], %s2423_s21  ;;  %s2439_s23 = sshll.u32 %s4128_s13, 10 }
  0x9d   : > { %v419_v2 = vld [vmem:[#allocation7 + $0x10] sm:$0xff]  ;;  %v3256_v3 = vpack.c.bf16 %v418_v1, %v417_v0  ;;  %v420_v4 = vld [vmem:[#allocation7 + $0x18] sm:$0xff]  ;;  %v421_v6 = vld [vmem:[#allocation7 + $0x20] sm:$0xff]  ;;  %s2301_s16 = sshll.u32 %s408_s18, 4  ;;  %s2288_s13 = scalar_lea.sflag [#allocation6], %s4333_s30  ;;  %s4520_s16 = int_to_ptr.vmem [resolvable:$true] %s2301_s16 }
  0x9e   : > { %v3260_v5 = vpack.c.bf16 %v420_v4, %v419_v2  ;;  %v422_v7 = vld [vmem:[#allocation7 + $0x28] sm:$0xff]  ;;  %v409_v9 = vld [vmem:[%s4339_s9] sm:$0xff]  ;;  %v423_v10 = vld [vmem:[#allocation7 + $0x30] sm:$0xff]  ;;  %s3970_s17 = scalar_lea.vmem %s4520_s16, 1024  ;;  %s4054_s25 = smov [#allocation13]  }
  0x9f   : > { %3257 = vmatprep.subr.bf16.mxu0 %v3256_v3  ;;  %v3264_v8 = vpack.c.bf16 %v422_v7, %v421_v6  ;;  %v424_v11 = vld [vmem:[#allocation7 + $0x38] sm:$0xff]  ;;  %2760 = vmatprep.mubr.f32.mxu0 %v409_v9  ;;  %v1068_v12 = vld [vmem:[#allocation9 + $0x180] sm:$0xff]  ;;  %v1069_v15 = vld [vmem:[#allocation9 + $0x188] sm:$0xff]  ;;  %v4053_v9 = vmov 0.0   ;;  %p3971_p3 = scmp.ne.s32.totalorder %s4520_s16, %s3970_s17  ;;  %s3974_s26 = sshll.u32 %s4054_s25, 4  ;;  %s3975_s26 = int_to_ptr.vmem [resolvable:$false] %s3974_s26 }
  0xa0   : > { %3259 = vmatpush3.bf16.msra.mxu0 %v3256_v3  ;;  %v3268_v13 = vpack.c.bf16 %v424_v11, %v423_v10  ;;  %v425_v14 = vld [vmem:[#allocation7 + $0x40] sm:$0xff]  ;;  %v426_v16 = vld [vmem:[#allocation7 + $0x48] sm:$0xff]  ;;  %v3384_v17 = vpack.c.bf16 %v1069_v15, %v1068_v12  ;;  %v1070_v18 = vld [vmem:[#allocation9 + $0x190] sm:$0xff]  ;;  %557 = vst [vmem:[#allocation2 + $0x20] sm:$0xff] %v4053_v9  ;;  %s3976_s19 = scalar_lea.vmem %s3975_s26, 2048  ;;  %p3977_p12 = scmp.lt.s32.totalorder %s4520_s16, %s3975_s26 }
  0xa1   : > { %3261 = vmatprep.subr.bf16.mxu0 %v3260_v5  ;;  %v1071_v19 = vld [vmem:[#allocation9 + $0x198] sm:$0xff]  ;;  %v1072_v21 = vld [vmem:[#allocation9 + $0x1a0] sm:$0xff]  ;;  %v1073_v22 = vld [vmem:[#allocation9 + $0x1a8] sm:$0xff]  ;;  %v3272_v23 = vpack.c.bf16 %v426_v16, %v425_v14  ;;  %558 = vst [vmem:[#allocation2 + $0x28] sm:$0x3] %v4053_v9  ;;  %p3972_p5 = pnand %p3971_p3, %p4278_p10  ;;  %p3978_p1 = scmp.lt.s32.totalorder %s3976_s19, %s3970_s17 }
  0xa2   : > { %v3388_v20 = vpack.c.bf16 %v1071_v19, %v1070_v18  ;;  %3385 = vmatprep.subr.bf16.mxu1 %v3384_v17  ;;  %v427_v24 = vld [vmem:[#allocation7 + $0x50] sm:$0xff]  ;;  %v428_v25 = vld [vmem:[#allocation7 + $0x58] sm:$0xff]  ;;  %v3392_v26 = vpack.c.bf16 %v1073_v22, %v1072_v21  ;;  %v429_v30 = vld [vmem:[#allocation7 + $0x60] sm:$0xff]  ;;  %553 = vst [vmem:[#allocation2] sm:$0xff] %v4053_v9 }
  0xa3   : > { %3387 = vmatpush3.bf16.msra.mxu1 %v3384_v17  ;;  %v1074_v27 = vld [vmem:[#allocation9 + $0x1b0] sm:$0xff]  ;;  %v1075_v28 = vld [vmem:[#allocation9 + $0x1b8] sm:$0xff]  ;;  %v3276_v29 = vpack.c.bf16 %v428_v25, %v427_v24  ;;  %v430_v31 = vld [vmem:[#allocation7 + $0x68] sm:$0xff]  ;;  %554 = vst [vmem:[#allocation2 + $0x8] sm:$0x3] %v4053_v9  ;;  %p3973_p7 = pneg %p3972_p5  ;;  %p3979_p2 = por %p3978_p1, %p3977_p12 }
  0xa4   : > { %3263 = vmatpush3.bf16.msra.mxu0 %v3260_v5  ;;  %3389 = vmatprep.subr.bf16.mxu1 %v3388_v20  ;;  %v3396_v32 = vpack.c.bf16 %v1075_v28, %v1074_v27  ;;  %v1076_v33 = vld [vmem:[#allocation9 + $0x1c0] sm:$0xff]  ;;  %v1077_v34 = vld [vmem:[#allocation9 + $0x1c8] sm:$0xff]  ;;  %v3280_v35 = vpack.c.bf16 %v430_v31, %v429_v30  ;;  %v431_v36 = vld [vmem:[#allocation7 + $0x70] sm:$0xff]  ;;  %555 = vst [vmem:[#allocation2 + $0x10] sm:$0xff] %v4053_v9 }
  0xa5   : > { %3265 = vmatprep.subr.bf16.mxu0 %v3264_v8  ;;  %v432_v37 = vld [vmem:[#allocation7 + $0x78] sm:$0xff]  ;;  %v3400_v38 = vpack.c.bf16 %v1077_v34, %v1076_v33  ;;  %v606_v40 = vld [vmem:[#allocation9] sm:$0xff]  ;;  %v607_v41 = vld [vmem:[#allocation9 + $0x8] sm:$0xff]  ;;  %556 = vst [vmem:[#allocation2 + $0x18] sm:$0x3] %v4053_v9  ;;  %p3980_p13 = pnand %p3979_p2, %p3973_p7 }
  0xa6   : > { %v3284_v39 = vpack.c.bf16 %v432_v37, %v431_v36  ;;  %v3288_v42 = vpack.c.bf16 %v607_v41, %v606_v40  ;;  %v608_v43 = vld [vmem:[#allocation9 + $0x10] sm:$0xff]  ;;  %v609_v44 = vld [vmem:[#allocation9 + $0x18] sm:$0xff]  ;;  %v410_v45 = vld [vmem:[%s4339_s9 + $0x8] sm:$0xff]  ;;  %559 = vst [vmem:[#allocation2 + $0x30] sm:$0xff] %v4053_v9 }
  0xa7   : > { %3391 = vmatpush3.bf16.msra.mxu1 %v3388_v20  ;;  %v411_v46 = vld [vmem:[%s4339_s9 + $0x10] sm:$0xff]  ;;  %v3292_v47 = vpack.c.bf16 %v609_v44, %v608_v43  ;;  %v610_v48 = vld [vmem:[#allocation9 + $0x20] sm:$0xff]  ;;  %v611_v49 = vld [vmem:[#allocation9 + $0x28] sm:$0xff]  ;;  %560 = vst [vmem:[#allocation2 + $0x38] sm:$0x3] %v4053_v9 }
  0xa8   : > { %3267 = vmatpush3.bf16.msra.mxu0 %v3264_v8  ;;  %3393 = vmatprep.subr.bf16.mxu1 %v3392_v26  ;;  %v412_v50 = vld [vmem:[%s4339_s9 + $0x18] sm:$0xff]  ;;  %v413_v51 = vld [vmem:[%s4339_s9 + $0x20] sm:$0xff]  ;;  %v3296_v52 = vpack.c.bf16 %v611_v49, %v610_v48  ;;  %v612_v53 = vld [vmem:[#allocation9 + $0x30] sm:$0xff]  ;;  %561 = vst [vmem:[#allocation2 + $0x40] sm:$0xff] %v4053_v9 }
  0xa9   : > { %3269 = vmatprep.subr.bf16.mxu0 %v3268_v13  ;;  %v613_v54 = vld [vmem:[#allocation9 + $0x38] sm:$0xff]  ;;  %v414_v55 = vld [vmem:[%s4339_s9 + $0x28] sm:$0xff]  ;;  %v415_v56 = vld [vmem:[%s4339_s9 + $0x30] sm:$0xff]  ;;  %562 = vst [vmem:[#allocation2 + $0x48] sm:$0x3] %v4053_v9 }
  0xaa   : > { %v3300_v57 = vpack.c.bf16 %v613_v54, %v612_v53  ;;  %v614_v58 = vld [vmem:[#allocation9 + $0x40] sm:$0xff]  ;;  %v615_v59 = vld [vmem:[#allocation9 + $0x48] sm:$0xff]  ;;  %v416_v60 = vld [vmem:[%s4339_s9 + $0x38] sm:$0xff]  ;;  %563 = vst [vmem:[#allocation2 + $0x50] sm:$0xff] %v4053_v9 }
  0xab   : > { %3395 = vmatpush3.bf16.msra.mxu1 %v3392_v26  ;;  %v3304_v61 = vpack.c.bf16 %v615_v59, %v614_v58  ;;  %v616_v62 = vld [vmem:[#allocation9 + $0x50] sm:$0xff]  ;;  %v617_v63 = vld [vmem:[#allocation9 + $0x58] sm:$0xff]  ;;  %v618_v4 = vld [vmem:[#allocation9 + $0x60] sm:$0xff]  ;;  %564 = vst [vmem:[#allocation2 + $0x58] sm:$0x3] %v4053_v9 }
  0xac   : > { %3271 = vmatpush3.bf16.msra.mxu0 %v3268_v13  ;;  %3397 = vmatprep.subr.bf16.mxu1 %v3396_v32  ;;  %v3308_v0 = vpack.c.bf16 %v617_v63, %v616_v62  ;;  %v1078_v1 = vld [vmem:[#allocation9 + $0x1d0] sm:$0xff]  ;;  %v1079_v2 = vld [vmem:[#allocation9 + $0x1d8] sm:$0xff]  ;;  %v619_v5 = vld [vmem:[#allocation9 + $0x68] sm:$0xff]  ;;  %565 = vst [vmem:[#allocation2 + $0x60] sm:$0xff] %v4053_v9 }
  0xad   : > { %3273 = vmatprep.subr.bf16.mxu0 %v3272_v23  ;;  %v3404_v3 = vpack.c.bf16 %v1079_v2, %v1078_v1  ;;  %v3312_v6 = vpack.c.bf16 %v619_v5, %v618_v4  ;;  %v1080_v7 = vld [vmem:[#allocation9 + $0x1e0] sm:$0xff]  ;;  %v1081_v8 = vld [vmem:[#allocation9 + $0x1e8] sm:$0xff]  ;;  %566 = vst [vmem:[#allocation2 + $0x68] sm:$0x3] %v4053_v9  ;;  %567 = vst [vmem:[#allocation2 + $0x70] sm:$0xff] %v4053_v9 }
  0xae   : > { %568 = vst [vmem:[#allocation2 + $0x78] sm:$0x3] %v4053_v9  ;;  %569 = vst [vmem:[#allocation2 + $0x80] sm:$0xff] %v4053_v9  ;;  %v3408_v10 = vpack.c.bf16 %v1081_v8, %v1080_v7  ;;  %v620_v11 = vld [vmem:[#allocation9 + $0x70] sm:$0xff]  ;;  %v621_v12 = vld [vmem:[#allocation9 + $0x78] sm:$0xff] }
  0xaf   : > { %3399 = vmatpush3.bf16.msra.mxu1 %v3396_v32  ;;  %570 = vst [vmem:[#allocation2 + $0x88] sm:$0x3] %v4053_v9  ;;  %571 = vst [vmem:[#allocation2 + $0x90] sm:$0xff] %v4053_v9  ;;  %v3316_v13 = vpack.c.bf16 %v621_v12, %v620_v11  ;;  %v1082_v14 = vld [vmem:[#allocation9 + $0x1f0] sm:$0xff]  ;;  %v1083_v15 = vld [vmem:[#allocation9 + $0x1f8] sm:$0xff] }
  0xb0   : > { %3275 = vmatpush3.bf16.msra.mxu0 %v3272_v23  ;;  %3401 = vmatprep.subr.bf16.mxu1 %v3400_v38  ;;  %572 = vst [vmem:[#allocation2 + $0x98] sm:$0x3] %v4053_v9  ;;  %v3412_v16 = vpack.c.bf16 %v1083_v15, %v1082_v14  ;;  %v760_v17 = vld [vmem:[#allocation9 + $0x80] sm:$0xff]  ;;  %v761_v18 = vld [vmem:[#allocation9 + $0x88] sm:$0xff]  ;;  %v763_v40 = vld [vmem:[#allocation9 + $0x98] sm:$0xff] }
  0xb1   : > { %3277 = vmatprep.subr.bf16.mxu0 %v3276_v29  ;;  %v3320_v19 = vpack.c.bf16 %v761_v18, %v760_v17  ;;  %v1222_v20 = vld [vmem:[#allocation9 + $0x200] sm:$0xff]  ;;  %v1223_v21 = vld [vmem:[#allocation9 + $0x208] sm:$0xff]  ;;  %v1224_v43 = vld [vmem:[#allocation9 + $0x210] sm:$0xff] }
  0xb2   : > { %v3416_v22 = vpack.c.bf16 %v1223_v21, %v1222_v20  ;;  %v2429_v23 = vld [vmem:[%s4571_s2] ss:$0 sm:$0xff]  ;;  %v1225_v44 = vld [vmem:[#allocation9 + $0x218] sm:$0xff]  ;;  %v1227_v58 = vld [vmem:[#allocation9 + $0x228] sm:$0xff] }
  0xb3   : > { %3403 = vmatpush3.bf16.msra.mxu1 %v3400_v38  ;;  %v1228_v2 = vld [vmem:[#allocation9 + $0x230] sm:$0xff]  ;;  %v768_v5 = vld [vmem:[#allocation9 + $0xc0] sm:$0xff]  ;;  %v769_v8 = vld [vmem:[#allocation9 + $0xc8] sm:$0xff] }
  0xb4   : > { %3279 = vmatpush3.bf16.msra.mxu0 %v3276_v29  ;;  %3405 = vmatprep.subr.bf16.mxu1 %v3404_v3  ;;  %v1230_v11 = vld [vmem:[#allocation9 + $0x240] sm:$0xff]  ;;  %v1231_v12 = vld [vmem:[#allocation9 + $0x248] sm:$0xff]  ;;  %v770_v14 = vld [vmem:[#allocation9 + $0xd0] sm:$0xff] }
  0xb5   : > { %3281 = vmatprep.subr.bf16.mxu0 %v3280_v35  ;;  %v771_v17 = vld [vmem:[#allocation9 + $0xd8] sm:$0xff]  ;;  %v3432_v18 = vpack.c.bf16 %v1231_v12, %v1230_v11  ;;  %v1384_v11 = vld [vmem:[#allocation9 + $0x2c0] sm:$0xff]  ;;  %v1385_v12 = vld [vmem:[#allocation9 + $0x2c8] sm:$0xff] }
  0xb6   : > { %v1233_v20 = vld [vmem:[#allocation9 + $0x258] sm:$0xff]  ;;  %v3340_v21 = vpack.c.bf16 %v771_v17, %v770_v14  ;;  %v897_v14 = vld [vmem:[#allocation2 + $0x2] sm:$0xff]  ;;  %v924_v17 = vld [vmem:[#allocation9 + $0x150] sm:$0xff] }
  0xb7   : > { %3407 = vmatpush3.bf16.msra.mxu1 %v3404_v3  ;;  %v1229_v3 = vld [vmem:[#allocation9 + $0x238] sm:$0xff] }
  0xb8   : > { %3283 = vmatpush3.bf16.msra.mxu0 %v3280_v35  ;;  %3409 = vmatprep.subr.bf16.mxu1 %v3408_v10 }
  0xb9   : > { %3285 = vmatprep.subr.bf16.mxu0 %v3284_v39 }
  0xbb   : > { %3411 = vmatpush3.bf16.msra.mxu1 %v3408_v10  ;;  %v3428_v10 = vpack.c.bf16 %v1229_v3, %v1228_v2  ;;  %v1382_v2 = vld [vmem:[#allocation9 + $0x2b0] sm:$0xff]  ;;  %v1383_v3 = vld [vmem:[#allocation9 + $0x2b8] sm:$0xff] }
  0xbc   : > { %3287 = vmatpush3.bf16.msra.mxu0 %v3284_v39  ;;  %3413 = vmatprep.subr.bf16.mxu1 %v3412_v16  ;;  %v762_v39 = vld [vmem:[#allocation9 + $0x90] sm:$0xff] }
  0xbd   : > { %3289 = vmatprep.subr.bf16.mxu0 %v3288_v42 }
  0xbf   : > { %2761 = vmatmul.mubr.f32.vlgmr.msra.gmra.mrb[0].mxu0 %v410_v45  ;;  %3415 = vmatpush3.bf16.msra.mxu1 %v3412_v16 }
  0xc0   : > { %2763 = vmatprep.mubr.f32.mxu0 %v411_v46  ;;  %3291 = vmatpush3.bf16.msra.mxu0 %v3288_v42 }
  0xc1   : > { %3293 = vmatprep.subr.bf16.mxu0 %v3292_v47  ;;  %3417 = vmatprep.subr.bf16.mxu1 %v3416_v22 }
  0xc3   : > { %2764 = vmatmul.mubr.f32.gmra.mrb[2].mxu0 %v412_v50 }
  0xc4   : > { %2766 = vmatprep.mubr.f32.mxu0 %v413_v51  ;;  %3295 = vmatpush3.bf16.msra.mxu0 %v3292_v47  ;;  %v3324_v47 = vpack.c.bf16 %v763_v40, %v762_v39  ;;  %v764_v51 = vld [vmem:[#allocation9 + $0xa0] sm:$0xff]  ;;  %v915_v40 = vld [vmem:[#allocation9 + $0x108] sm:$0xff] }
  0xc5   : > { %3297 = vmatprep.subr.bf16.mxu0 %v3296_v52  ;;  %v914_v39 = vld [vmem:[#allocation9 + $0x100] sm:$0xff] }
  0xc7   : > { %2767 = vmatmul.mubr.f32.gmra.mrb[4].mxu0 %v414_v55  ;;  %v3420_v55 = vpack.c.bf16 %v1225_v44, %v1224_v43  ;;  %v1376_v43 = vld [vmem:[#allocation9 + $0x280] sm:$0xff]  ;;  %v1377_v44 = vld [vmem:[#allocation9 + $0x288] sm:$0xff] }
  0xc8   : > { %2769 = vmatprep.mubr.f32.mxu0 %v415_v56  ;;  %3299 = vmatpush3.bf16.msra.mxu0 %v3296_v52  ;;  %v765_v52 = vld [vmem:[#allocation9 + $0xa8] sm:$0xff] }
  0xc9   : > { %3301 = vmatprep.subr.bf16.mxu0 %v3300_v57 }
  0xcb   : > { %2770 = vmatmul.mubr.f32.gmra.mrb[6].mxu0 %v416_v60  ;;  %v3328_v60 = vpack.c.bf16 %v765_v52, %v764_v51  ;;  %v1379_v51 = vld [vmem:[#allocation9 + $0x298] sm:$0xff] }
  0xcc   : > { %3303 = vmatpush3.bf16.msra.mxu0 %v3300_v57  ;;  %2804 = vmatprep.mubr.f32.mxu0 %v4053_v9  ;;  %v1226_v57 = vld [vmem:[#allocation9 + $0x220] sm:$0xff] }
  0xcd   : > { %3305 = vmatprep.subr.bf16.mxu0 %v3304_v61  ;;  %v3424_v1 = vpack.c.bf16 %v1227_v58, %v1226_v57  ;;  %v1380_v58 = vld [vmem:[#allocation9 + $0x2a0] sm:$0xff] }
  0xd0   : > { %3307 = vmatpush3.bf16.msra.mxu0 %v3304_v61  ;;  %v766_v61 = vld [vmem:[#allocation9 + $0xb0] sm:$0xff] }
  0xd1   : > { %3309 = vmatprep.subr.bf16.mxu0 %v3308_v0 }
  0xd4   : > { %3311 = vmatpush3.bf16.msra.mxu0 %v3308_v0  ;;  %v767_v0 = vld [vmem:[#allocation9 + $0xb8] sm:$0xff] }
  0xd5   : > { %3313 = vmatprep.subr.bf16.mxu0 %v3312_v6  ;;  %v3332_v4 = vpack.c.bf16 %v767_v0, %v766_v61  ;;  %v920_v0 = vld [vmem:[#allocation9 + $0x130] sm:$0xff] }
  0xd8   : > { %3315 = vmatpush3.bf16.msra.mxu0 %v3312_v6 }
  0xd9   : > { %3317 = vmatprep.subr.bf16.mxu0 %v3316_v13 }
  0xdc   : > { %3319 = vmatpush3.bf16.msra.mxu0 %v3316_v13  ;;  %v3336_v13 = vpack.c.bf16 %v769_v8, %v768_v5  ;;  %v922_v5 = vld [vmem:[#allocation9 + $0x140] sm:$0xff]  ;;  %v923_v8 = vld [vmem:[#allocation9 + $0x148] sm:$0xff] }
  0xdd   : > { %3321 = vmatprep.subr.bf16.mxu0 %v3320_v19 }
 0x192   : > { %v2762_v24 = vpop.f32.mrb[0].mxu0 }
 0x193   : > { %v512_v25 = vadd.f32 %v2762_v24, %v2429_v23  ;;  %v506_v26 = vpop.f32.mrb[1].mxu0  ;;  %v773_v24 = vld [vmem:[#allocation9 + $0xe8] sm:$0xff] }
 0x194   : > { %v507_v27 = vadd.f32 %v2429_v23, %v506_v26  ;;  %v1234_v26 = vld [vmem:[#allocation9 + $0x260] sm:$0xff] }
 0x195   : > { %v4385_v28 = vmax.f32 %v512_v25, 0.0 }
 0x196   : > { %v4387_v29 = vmax.f32 %v507_v27, 0.0  ;;  %v2765_v30 = vpop.f32.mrb[2].mxu0  ;;  %v1235_v27 = vld [vmem:[#allocation9 + $0x268] sm:$0xff] }
 0x197   : > { %575 = vst [vmem:[#allocation2 + $0x21] sm:$0xff] %v4385_v28  ;;  %v522_v31 = vadd.f32 %v2765_v30, %v2429_v23  ;;  %v516_v32 = vpop.f32.mrb[3].mxu0 }
 0x198   : > { %574 = vst [vmem:[#allocation2 + $0x11] sm:$0xff] %v4387_v29  ;;  %v517_v33 = vadd.f32 %v2429_v23, %v516_v32  ;;  %v775_v32 = vld [vmem:[#allocation9 + $0xf8] sm:$0xff] }
 0x199   : > { %v4391_v34 = vmax.f32 %v522_v31, 0.0  ;;  %v774_v31 = vld [vmem:[#allocation9 + $0xf0] sm:$0xff] }
 0x19a   : > { %v4393_v35 = vmax.f32 %v517_v33, 0.0  ;;  %v2768_v36 = vpop.f32.mrb[4].mxu0  ;;  %v3440_v33 = vpack.c.bf16 %v1235_v27, %v1234_v26  ;;  %v1388_v27 = vld [vmem:[#allocation9 + $0x2e0] sm:$0xff] }
 0x19b   : > { %577 = vst [vmem:[#allocation2 + $0x41] sm:$0xff] %v4391_v34  ;;  %v532_v37 = vadd.f32 %v2768_v36, %v2429_v23  ;;  %v526_v38 = vpop.f32.mrb[5].mxu0  ;;  %v1236_v36 = vld [vmem:[#allocation9 + $0x270] sm:$0xff] }
 0x19c   : > { %576 = vst [vmem:[#allocation2 + $0x31] sm:$0xff] %v4393_v35  ;;  %v527_v41 = vadd.f32 %v2429_v23, %v526_v38  ;;  %v3348_v38 = vpack.c.bf16 %v775_v32, %v774_v31  ;;  %v928_v32 = vld [vmem:[#allocation9 + $0x170] sm:$0xff] }
 0x19d   : > { %v4397_v42 = vmax.f32 %v532_v37, 0.0  ;;  %v1237_v37 = vld [vmem:[#allocation9 + $0x278] sm:$0xff] }
 0x19e   : > { %v4399_v45 = vmax.f32 %v527_v41, 0.0  ;;  %v2771_v46 = vpop.f32.mrb[6].mxu0  ;;  %v4403_v54 = vld [vmem:[#allocation2 + $0x20] sm:$0xff]  ;;  %v3444_v41 = vpack.c.bf16 %v1237_v37, %v1236_v36  ;;  %v1390_v37 = vld [vmem:[#allocation9 + $0x2f0] sm:$0xff] }
 0x19f   : > { %579 = vst [vmem:[#allocation2 + $0x61] sm:$0xff] %v4397_v42  ;;  %v542_v48 = vadd.f32 %v2771_v46, %v2429_v23  ;;  %v536_v49 = vpop.f32.mrb[7].mxu0  ;;  %v591_v50 = vld [vmem:[#allocation2 + $0x10] sm:$0xff]  ;;  %v3352_v46 = vpack.c.bf16 %v915_v40, %v914_v39 }
 0x1a0   : > { %578 = vst [vmem:[#allocation2 + $0x51] sm:$0xff] %v4399_v45  ;;  %v537_v53 = vadd.f32 %v2429_v23, %v536_v49  ;;  %2805 = vmatmul.mubr.f32.vlgmr.msra.gmra.mrb[8].mxu0 %v591_v50  ;;  %2936 = vmatprep.mubr.f32.mxu1 %v591_v50  ;;  %v772_v23 = vld [vmem:[#allocation9 + $0xe0] sm:$0xff]  ;;  %v3448_v49 = vpack.c.bf16 %v1377_v44, %v1376_v43  ;;  %v1378_v50 = vld [vmem:[#allocation9 + $0x290] sm:$0xff]  ;;  %v1532_v43 = vld [vmem:[#allocation9 + $0x308] sm:$0xff] }
 0x1a1   : > { %v4405_v56 = vmax.f32 %v542_v48, 0.0  ;;  %3323 = vmatpush3.bf16.msra.mxu0 %v3320_v19  ;;  %2807 = vmatprep.mubr.f32.mxu0 %v4403_v54  ;;  %v1232_v19 = vld [vmem:[#allocation9 + $0x250] sm:$0xff]  ;;  %v3344_v30 = vpack.c.bf16 %v773_v24, %v772_v23  ;;  %v917_v48 = vld [vmem:[#allocation9 + $0x118] sm:$0xff]  ;;  %v3452_v57 = vpack.c.bf16 %v1379_v51, %v1378_v50  ;;  %v926_v24 = vld [vmem:[#allocation9 + $0x160] sm:$0xff] }
 0x1a2   : > { %v4408_v59 = vmax.f32 %v537_v53, 0.0  ;;  %2937 = vmatmul.mubr.f32.vlgmr.msra.gmra.mrb[0].mxu1 %v4403_v54  ;;  %3325 = vmatprep.subr.bf16.mxu0 %v3324_v47  ;;  %v4414_v63 = vld [vmem:[#allocation2 + $0x40] sm:$0xff]  ;;  %v3436_v25 = vpack.c.bf16 %v1233_v20, %v1232_v19  ;;  %v3464_v19 = vpack.c.bf16 %v1385_v12, %v1384_v11  ;;  %v1386_v20 = vld [vmem:[#allocation9 + $0x2d0] sm:$0xff]  ;;  %v1536_v51 = vld [vmem:[#allocation9 + $0x328] sm:$0xff] }
 0x1a3   : > { %581 = vst [vmem:[#allocation2 + $0x81] sm:$0xff] %v4405_v56  ;;  %3419 = vmatpush3.bf16.msra.mxu1 %v3416_v22  ;;  %v4412_v62 = vld [vmem:[#allocation2 + $0x30] sm:$0xff]  ;;  %v743_v22 = vld [vmem:[#allocation2 + $0x1] sm:$0xff] }
 0x1a4   : > { %580 = vst [vmem:[#allocation2 + $0x71] sm:$0xff] %v4408_v59  ;;  %2939 = vmatprep.mubr.f32.mxu1 %v4412_v62  ;;  %3421 = vmatprep.subr.bf16.mxu1 %v3420_v55  ;;  %v918_v53 = vld [vmem:[#allocation9 + $0x120] sm:$0xff]  ;;  %v1544_v12 = vld [vmem:[#allocation9 + $0x368] sm:$0xff] }
 0x1a5   : > { %3327 = vmatpush3.bf16.msra.mxu0 %v3324_v47  ;;  %v916_v47 = vld [vmem:[#allocation9 + $0x110] sm:$0xff]  ;;  %v1535_v50 = vld [vmem:[#allocation9 + $0x320] sm:$0xff] }
 0x1a6   : > { %2940 = vmatmul.mubr.f32.gmra.mrb[2].mxu1 %v4414_v63  ;;  %3329 = vmatprep.subr.bf16.mxu0 %v3328_v60  ;;  %v4421_v7 = vld [vmem:[#allocation2 + $0x60] sm:$0xff]  ;;  %v3356_v52 = vpack.c.bf16 %v917_v48, %v916_v47  ;;  %v1534_v47 = vld [vmem:[#allocation9 + $0x318] sm:$0xff] }
 0x1a7   : > { %3423 = vmatpush3.bf16.msra.mxu1 %v3420_v55  ;;  %v4419_v6 = vld [vmem:[#allocation2 + $0x50] sm:$0xff]  ;;  %2808 = vmatmul.mubr.f32.gmra.mrb[10].mxu0 %v4412_v62  ;;  %v919_v55 = vld [vmem:[#allocation9 + $0x128] sm:$0xff]  ;;  %v1543_v11 = vld [vmem:[#allocation9 + $0x360] sm:$0xff] }
 0x1a8   : > { %2942 = vmatprep.mubr.f32.mxu1 %v4419_v6  ;;  %3425 = vmatprep.subr.bf16.mxu1 %v3424_v1  ;;  %v3360_v61 = vpack.c.bf16 %v919_v55, %v918_v53  ;;  %v4451_v48 = vld [vmem:[#allocation2 + $0x22] sm:$0xff]  ;;  %v3488_v55 = vpack.c.bf16 %v1536_v51, %v1535_v50  ;;  %v1845_v50 = vld [vmem:[#allocation9 + $0x430] sm:$0xff]  ;;  %v1846_v51 = vld [vmem:[#allocation9 + $0x438] sm:$0xff] }
 0x1a9   : > { %3331 = vmatpush3.bf16.msra.mxu0 %v3328_v60  ;;  %2810 = vmatprep.mubr.f32.mxu0 %v4414_v63  ;;  %v1381_v60 = vld [vmem:[#allocation9 + $0x2a8] sm:$0xff] }
 0x1aa   : > { %2943 = vmatmul.mubr.f32.gmra.mrb[4].mxu1 %v4421_v7  ;;  %3333 = vmatprep.subr.bf16.mxu0 %v3332_v4  ;;  %v4429_v16 = vld [vmem:[#allocation2 + $0x80] sm:$0xff] }
 0x1ab   : > { %3427 = vmatpush3.bf16.msra.mxu1 %v3424_v1  ;;  %v4427_v15 = vld [vmem:[#allocation2 + $0x70] sm:$0xff]  ;;  %2811 = vmatmul.mubr.f32.gmra.mrb[12].mxu0 %v4419_v6  ;;  %v921_v1 = vld [vmem:[#allocation9 + $0x138] sm:$0xff]  ;;  %v4459_v53 = vld [vmem:[#allocation2 + $0x42] sm:$0xff] }
 0x1ac   : > { %2945 = vmatprep.mubr.f32.mxu1 %v4427_v15  ;;  %3429 = vmatprep.subr.bf16.mxu1 %v3428_v10 }
 0x1ad   : > { %3335 = vmatpush3.bf16.msra.mxu0 %v3332_v4  ;;  %2813 = vmatprep.mubr.f32.mxu0 %v4421_v7  ;;  %v3364_v4 = vpack.c.bf16 %v921_v1, %v920_v0  ;;  %v1539_v1 = vld [vmem:[#allocation9 + $0x340] sm:$0xff] }
 0x1ae   : > { %2946 = vmatmul.mubr.f32.gmra.mrb[6].mxu1 %v4429_v16  ;;  %3337 = vmatprep.subr.bf16.mxu0 %v3336_v13 }
 0x1af   : > { %3431 = vmatpush3.bf16.msra.mxu1 %v3428_v10  ;;  %2980 = vmatprep.mubr.f32.mxu1 %v4387_v29  ;;  %v3460_v10 = vpack.c.bf16 %v1383_v3, %v1382_v2  ;;  %v4471_v2 = vld [vmem:[#allocation2 + $0x72] sm:$0xff] }
 0x1b0   : > { %3433 = vmatprep.subr.bf16.mxu1 %v3432_v18  ;;  %2814 = vmatmul.mubr.f32.gmra.mrb[14].mxu0 %v4427_v15 }
 0x1b1   : > { %3339 = vmatpush3.bf16.msra.mxu0 %v3336_v13  ;;  %2848 = vmatprep.mubr.f32.mxu0 %v743_v22  ;;  %v3368_v13 = vpack.c.bf16 %v923_v8, %v922_v5  ;;  %v1359_v22 = vld [vmem:[#allocation2 + $0x12] sm:$0xff] }
 0x1b2   : > { %3341 = vmatprep.subr.bf16.mxu0 %v3340_v21  ;;  %v1541_v5 = vld [vmem:[#allocation9 + $0x350] sm:$0xff]  ;;  %v1542_v8 = vld [vmem:[#allocation9 + $0x358] sm:$0xff] }
 0x1b3   : > { %3435 = vmatpush3.bf16.msra.mxu1 %v3432_v18  ;;  %v925_v18 = vld [vmem:[#allocation9 + $0x158] sm:$0xff] }
 0x1b4   : > { %3437 = vmatprep.subr.bf16.mxu1 %v3436_v25  ;;  %v3372_v23 = vpack.c.bf16 %v925_v18, %v924_v17  ;;  %v1546_v17 = vld [vmem:[#allocation9 + $0x378] sm:$0xff] }
 0x1b5   : > { %3343 = vmatpush3.bf16.msra.mxu0 %v3340_v21  ;;  %v1387_v21 = vld [vmem:[#allocation9 + $0x2d8] sm:$0xff] }
 0x1b6   : > { %3345 = vmatprep.subr.bf16.mxu0 %v3344_v30  ;;  %v3468_v26 = vpack.c.bf16 %v1387_v21, %v1386_v20  ;;  %v1686_v20 = vld [vmem:[#allocation9 + $0x388] sm:$0xff] }
 0x1b7   : > { %3439 = vmatpush3.bf16.msra.mxu1 %v3436_v25  ;;  %v927_v25 = vld [vmem:[#allocation9 + $0x168] sm:$0xff] }
 0x1b8   : > { %3441 = vmatprep.subr.bf16.mxu1 %v3440_v33  ;;  %v3376_v31 = vpack.c.bf16 %v927_v25, %v926_v24  ;;  %v1689_v24 = vld [vmem:[#allocation9 + $0x3a0] sm:$0xff]  ;;  %v1690_v25 = vld [vmem:[#allocation9 + $0x3a8] sm:$0xff] }
 0x1b9   : > { %3347 = vmatpush3.bf16.msra.mxu0 %v3344_v30  ;;  %v1389_v30 = vld [vmem:[#allocation9 + $0x2e8] sm:$0xff] }
 0x1ba   : > { %3349 = vmatprep.subr.bf16.mxu0 %v3348_v38  ;;  %v3472_v36 = vpack.c.bf16 %v1389_v30, %v1388_v27  ;;  %v1691_v27 = vld [vmem:[#allocation9 + $0x3b0] sm:$0xff]  ;;  %v1692_v30 = vld [vmem:[#allocation9 + $0x3b8] sm:$0xff] }
 0x1bb   : > { %3443 = vmatpush3.bf16.msra.mxu1 %v3440_v33  ;;  %v929_v33 = vld [vmem:[#allocation9 + $0x178] sm:$0xff] }
 0x1bc   : > { %3445 = vmatprep.subr.bf16.mxu1 %v3444_v41  ;;  %v3380_v39 = vpack.c.bf16 %v929_v33, %v928_v32  ;;  %v1693_v32 = vld [vmem:[#allocation9 + $0x3c0] sm:$0xff]  ;;  %v1694_v33 = vld [vmem:[#allocation9 + $0x3c8] sm:$0xff] }
 0x1bd   : > { %3351 = vmatpush3.bf16.msra.mxu0 %v3348_v38  ;;  %v1391_v38 = vld [vmem:[#allocation9 + $0x2f8] sm:$0xff] }
 0x1be   : > { %3353 = vmatprep.subr.bf16.mxu0 %v3352_v46  ;;  %v3476_v40 = vpack.c.bf16 %v1391_v38, %v1390_v37  ;;  %v1698_v37 = vld [vmem:[#allocation9 + $0x3e8] sm:$0xff] }
 0x1bf   : > { %3447 = vmatpush3.bf16.msra.mxu1 %v3444_v41  ;;  %v1531_v41 = vld [vmem:[#allocation9 + $0x300] sm:$0xff] }
 0x1c0   : > { %2849 = vmatmul.mubr.f32.vlgmr.msra.gmra.mrb[8].mxu0 %v4387_v29  ;;  %3449 = vmatprep.subr.bf16.mxu1 %v3448_v49  ;;  %v3456_v29 = vpack.c.bf16 %v1381_v60, %v1380_v58  ;;  %v3480_v44 = vpack.c.bf16 %v1532_v43, %v1531_v41  ;;  %v1538_v58 = vld [vmem:[#allocation9 + $0x338] sm:$0xff]  ;;  %v1840_v41 = vld [vmem:[#allocation9 + $0x408] sm:$0xff]  ;;  %v1841_v43 = vld [vmem:[#allocation9 + $0x410] sm:$0xff] }
 0x1c1   : > { %2851 = vmatprep.mubr.f32.mxu0 %v4385_v28  ;;  %3355 = vmatpush3.bf16.msra.mxu0 %v3352_v46  ;;  %v1533_v46 = vld [vmem:[#allocation9 + $0x310] sm:$0xff] }
 0x1c2   : > { %2981 = vmatmul.mubr.f32.vlgmr.msra.gmra.mrb[0].mxu1 %v4385_v28  ;;  %3357 = vmatprep.subr.bf16.mxu0 %v3356_v52  ;;  %v4463_v60 = vld [vmem:[#allocation2 + $0x52] sm:$0xff] }
 0x1c3   : > { %2983 = vmatprep.mubr.f32.mxu1 %v4393_v35  ;;  %3451 = vmatpush3.bf16.msra.mxu1 %v3448_v49  ;;  %v3484_v49 = vpack.c.bf16 %v1534_v47, %v1533_v46  ;;  %v1843_v46 = vld [vmem:[#allocation9 + $0x420] sm:$0xff]  ;;  %v1844_v47 = vld [vmem:[#allocation9 + $0x428] sm:$0xff] }
 0x1c4   : > { %2852 = vmatmul.mubr.f32.gmra.mrb[10].mxu0 %v4393_v35  ;;  %3453 = vmatprep.subr.bf16.mxu1 %v3452_v57 }
 0x1c5   : > { %2854 = vmatprep.mubr.f32.mxu0 %v4391_v34  ;;  %3359 = vmatpush3.bf16.msra.mxu0 %v3356_v52  ;;  %v4455_v52 = vld [vmem:[#allocation2 + $0x32] sm:$0xff] }
 0x1c6   : > { %2984 = vmatmul.mubr.f32.gmra.mrb[2].mxu1 %v4391_v34  ;;  %3361 = vmatprep.subr.bf16.mxu0 %v3360_v61 }
 0x1c7   : > { %2986 = vmatprep.mubr.f32.mxu1 %v4399_v45  ;;  %3455 = vmatpush3.bf16.msra.mxu1 %v3452_v57  ;;  %v1537_v57 = vld [vmem:[#allocation9 + $0x330] sm:$0xff] }
 0x1c8   : > { %2855 = vmatmul.mubr.f32.gmra.mrb[12].mxu0 %v4399_v45  ;;  %3457 = vmatprep.subr.bf16.mxu1 %v3456_v29  ;;  %v3492_v0 = vpack.c.bf16 %v1538_v58, %v1537_v57  ;;  %v1847_v57 = vld [vmem:[#allocation9 + $0x440] sm:$0xff]  ;;  %v1848_v58 = vld [vmem:[#allocation9 + $0x448] sm:$0xff] }
 0x1c9   : > { %2857 = vmatprep.mubr.f32.mxu0 %v4397_v42  ;;  %3363 = vmatpush3.bf16.msra.mxu0 %v3360_v61  ;;  %v4467_v61 = vld [vmem:[#allocation2 + $0x62] sm:$0xff] }
 0x1ca   : > { %2987 = vmatmul.mubr.f32.gmra.mrb[4].mxu1 %v4397_v42  ;;  %3365 = vmatprep.subr.bf16.mxu0 %v3364_v4 }
 0x1cb   : > { %2989 = vmatprep.mubr.f32.mxu1 %v4408_v59  ;;  %3459 = vmatpush3.bf16.msra.mxu1 %v3456_v29  ;;  %v1540_v29 = vld [vmem:[#allocation9 + $0x348] sm:$0xff] }
 0x1cc   : > { %2858 = vmatmul.mubr.f32.gmra.mrb[14].mxu0 %v4408_v59  ;;  %3461 = vmatprep.subr.bf16.mxu1 %v3460_v10  ;;  %v3496_v3 = vpack.c.bf16 %v1540_v29, %v1539_v1  ;;  %v1850_v1 = vld [vmem:[#allocation9 + $0x458] sm:$0xff]  ;;  %v1852_v29 = vld [vmem:[#allocation9 + $0x468] sm:$0xff] }
 0x1cd   : > { %3367 = vmatpush3.bf16.msra.mxu0 %v3364_v4  ;;  %2892 = vmatprep.mubr.f32.mxu0 %v897_v14  ;;  %v4475_v4 = vld [vmem:[#allocation2 + $0x82] sm:$0xff]  ;;  %v1545_v14 = vld [vmem:[#allocation9 + $0x370] sm:$0xff] }
 0x1ce   : > { %2990 = vmatmul.mubr.f32.gmra.mrb[6].mxu1 %v4405_v56  ;;  %3369 = vmatprep.subr.bf16.mxu0 %v3368_v13  ;;  %v3508_v18 = vpack.c.bf16 %v1546_v17, %v1545_v14  ;;  %v2011_v14 = vld [vmem:[#allocation10 + $0x20] sm:$0xff]  ;;  %v2012_v17 = vld [vmem:[#allocation10 + $0x28] sm:$0xff] }
 0x1cf   : > { %3463 = vmatpush3.bf16.msra.mxu1 %v3460_v10  ;;  %3024 = vmatprep.mubr.f32.mxu1 %v1359_v22  ;;  %v3500_v10 = vpack.c.bf16 %v1542_v8, %v1541_v5  ;;  %v1854_v5 = vld [vmem:[#allocation9 + $0x478] sm:$0xff]  ;;  %v2007_v8 = vld [vmem:[#allocation10] sm:$0xff] }
 0x1d0   : > { %3465 = vmatprep.subr.bf16.mxu1 %v3464_v19 }
 0x1d1   : > { %3371 = vmatpush3.bf16.msra.mxu0 %v3368_v13  ;;  %v3504_v13 = vpack.c.bf16 %v1544_v12, %v1543_v11  ;;  %v2009_v11 = vld [vmem:[#allocation10 + $0x10] sm:$0xff] }
 0x1d2   : > { %3373 = vmatprep.subr.bf16.mxu0 %v3372_v23 }
 0x1d3   : > { %3467 = vmatpush3.bf16.msra.mxu1 %v3464_v19  ;;  %v1685_v19 = vld [vmem:[#allocation9 + $0x380] sm:$0xff] }
 0x1d4   : > { %3469 = vmatprep.subr.bf16.mxu1 %v3468_v26  ;;  %v3512_v21 = vpack.c.bf16 %v1686_v20, %v1685_v19  ;;  %v2013_v19 = vld [vmem:[#allocation10 + $0x30] sm:$0xff]  ;;  %v2014_v20 = vld [vmem:[#allocation10 + $0x38] sm:$0xff] }
 0x1d5   : > { %3375 = vmatpush3.bf16.msra.mxu0 %v3372_v23  ;;  %v1688_v23 = vld [vmem:[#allocation9 + $0x398] sm:$0xff] }
 0x1d6   : > { %3377 = vmatprep.subr.bf16.mxu0 %v3376_v31 }
 0x1d7   : > { %3471 = vmatpush3.bf16.msra.mxu1 %v3468_v26  ;;  %v3520_v26 = vpack.c.bf16 %v1690_v25, %v1689_v24  ;;  %v2020_v25 = vld [vmem:[#allocation10 + $0x68] sm:$0xff] }
 0x1d8   : > { %3473 = vmatprep.subr.bf16.mxu1 %v3472_v36 }
 0x1d9   : > { %3379 = vmatpush3.bf16.msra.mxu0 %v3376_v31  ;;  %v3524_v31 = vpack.c.bf16 %v1692_v30, %v1691_v27  ;;  %v2135_v30 = vld [vmem:[#allocation12] sm:$0xff] }
 0x1da   : > { %3381 = vmatprep.subr.bf16.mxu0 %v3380_v39 }
 0x1db   : > { %3475 = vmatpush3.bf16.msra.mxu1 %v3472_v36  ;;  %v1696_v36 = vld [vmem:[#allocation9 + $0x3d8] sm:$0xff] }
 0x1dc   : > { %3477 = vmatprep.subr.bf16.mxu1 %v3476_v40 }
 0x1dd   : > { %3383 = vmatpush3.bf16.msra.mxu0 %v3380_v39  ;;  %v1700_v39 = vld [vmem:[#allocation9 + $0x3f8] sm:$0xff] }
 0x1df   : > { %3479 = vmatpush3.bf16.msra.mxu1 %v3476_v40  ;;  %v1839_v40 = vld [vmem:[#allocation9 + $0x400] sm:$0xff] }
 0x1e0   : > { %2893 = vmatmul.mubr.f32.vlgmr.msra.gmra.mrb[8].mxu0 %v1359_v22  ;;  %3481 = vmatprep.subr.bf16.mxu1 %v3480_v44  ;;  %v1687_v22 = vld [vmem:[#allocation9 + $0x390] sm:$0xff] }
 0x1e1   : > { %2895 = vmatprep.mubr.f32.mxu0 %v4451_v48 }
 0x1e2   : > { %3025 = vmatmul.mubr.f32.vlgmr.msra.gmra.mrb[0].mxu1 %v4451_v48 }
 0x1e3   : > { %3027 = vmatprep.mubr.f32.mxu1 %v4455_v52  ;;  %3483 = vmatpush3.bf16.msra.mxu1 %v3480_v44  ;;  %v1842_v44 = vld [vmem:[#allocation9 + $0x418] sm:$0xff] }
 0x1e4   : > { %2896 = vmatmul.mubr.f32.gmra.mrb[10].mxu0 %v4455_v52  ;;  %3485 = vmatprep.subr.bf16.mxu1 %v3484_v49 }
 0x1e5   : > { %2898 = vmatprep.mubr.f32.mxu0 %v4459_v53 }
 0x1e6   : > { %3028 = vmatmul.mubr.f32.gmra.mrb[2].mxu1 %v4459_v53 }
 0x1e7   : > { %3030 = vmatprep.mubr.f32.mxu1 %v4463_v60  ;;  %3487 = vmatpush3.bf16.msra.mxu1 %v3484_v49  ;;  %v3552_v49 = vpack.c.bf16 %v1844_v47, %v1843_v46  ;;  %v2138_v46 = vld [vmem:[#allocation12 + $0x18] sm:$0xff] }
 0x1e8   : > { %2899 = vmatmul.mubr.f32.gmra.mrb[12].mxu0 %v4463_v60  ;;  %3489 = vmatprep.subr.bf16.mxu1 %v3488_v55 }
 0x1e9   : > { %2901 = vmatprep.mubr.f32.mxu0 %v4467_v61 }
 0x1ea   : > { %3031 = vmatmul.mubr.f32.gmra.mrb[4].mxu1 %v4467_v61 }
 0x1eb   : > { %3033 = vmatprep.mubr.f32.mxu1 %v4471_v2  ;;  %3491 = vmatpush3.bf16.msra.mxu1 %v3488_v55  ;;  %v3556_v55 = vpack.c.bf16 %v1846_v51, %v1845_v50 }
 0x1ec   : > { %2902 = vmatmul.mubr.f32.gmra.mrb[14].mxu0 %v4471_v2  ;;  %3493 = vmatprep.subr.bf16.mxu1 %v3492_v0 }
 0x1ee   : > { %3034 = vmatmul.mubr.f32.gmra.mrb[6].mxu1 %v4475_v4 }
 0x1ef   : > { %3495 = vmatpush3.bf16.msra.mxu1 %v3492_v0  ;;  %3068 = vmatprep.mubr.f32.mxu1 %v4403_v54  ;;  %v3516_v54 = vpack.c.bf16 %v1688_v23, %v1687_v22  ;;  %v1849_v0 = vld [vmem:[#allocation9 + $0x450] sm:$0xff]  ;;  %v2016_v22 = vld [vmem:[#allocation10 + $0x48] sm:$0xff] }
 0x1f0   : > { %3497 = vmatprep.subr.bf16.mxu1 %v3496_v3 }
 0x1f3   : > { %3499 = vmatpush3.bf16.msra.mxu1 %v3496_v3 }
 0x1f4   : > { %3501 = vmatprep.subr.bf16.mxu1 %v3500_v10 }
 0x1f7   : > { %3503 = vmatpush3.bf16.msra.mxu1 %v3500_v10  ;;  %v2008_v10 = vld [vmem:[#allocation10 + $0x8] sm:$0xff] }
 0x1f8   : > { %3505 = vmatprep.subr.bf16.mxu1 %v3504_v13  ;;  %v3576_v12 = vpack.c.bf16 %v2008_v10, %v2007_v8 }
 0x1fa   : > { %3577 = vmatprep.subr.bf16.mxu0 %v3576_v12 }
 0x1fb   : > { %3507 = vmatpush3.bf16.msra.mxu1 %v3504_v13  ;;  %3579 = vmatpush3.bf16.msra.mxu0 %v3576_v12  ;;  %v2142_v12 = vld [vmem:[#allocation12 + $0x38] sm:$0xff] }
 0x1fc   : > { %3509 = vmatprep.subr.bf16.mxu1 %v3508_v18 }
 0x1ff   : > { %3511 = vmatpush3.bf16.msra.mxu1 %v3508_v18  ;;  %v3584_v18 = vpack.c.bf16 %v2012_v17, %v2011_v14 }
 0x200   : > { %3513 = vmatprep.subr.bf16.mxu1 %v3512_v21 }
 0x202   : > { %3069 = vmatmul.mubr.f32.vlgmr.msra.gmra.mrb[0].mxu1 %v4412_v62  ;;  %v3528_v62 = vpack.c.bf16 %v1694_v33, %v1693_v32 }
 0x203   : > { %3071 = vmatprep.mubr.f32.mxu1 %v4414_v63  ;;  %3515 = vmatpush3.bf16.msra.mxu1 %v3512_v21  ;;  %v1695_v63 = vld [vmem:[#allocation9 + $0x3d0] sm:$0xff]  ;;  %v3588_v21 = vpack.c.bf16 %v2014_v20, %v2013_v19 }
 0x204   : > { %3517 = vmatprep.subr.bf16.mxu1 %v3516_v54 }
 0x206   : > { %3072 = vmatmul.mubr.f32.gmra.mrb[2].mxu1 %v4419_v6  ;;  %v3532_v6 = vpack.c.bf16 %v1696_v36, %v1695_v63 }
 0x207   : > { %3074 = vmatprep.mubr.f32.mxu1 %v4421_v7  ;;  %3519 = vmatpush3.bf16.msra.mxu1 %v3516_v54  ;;  %v1697_v7 = vld [vmem:[#allocation9 + $0x3e0] sm:$0xff]  ;;  %v2017_v54 = vld [vmem:[#allocation10 + $0x50] sm:$0xff] }
 0x208   : > { %3521 = vmatprep.subr.bf16.mxu1 %v3520_v26  ;;  %v3536_v38 = vpack.c.bf16 %v1698_v37, %v1697_v7 }
 0x20a   : > { %3075 = vmatmul.mubr.f32.gmra.mrb[4].mxu1 %v4427_v15  ;;  %v1699_v15 = vld [vmem:[#allocation9 + $0x3f0] sm:$0xff] }
 0x20b   : > { %3077 = vmatprep.mubr.f32.mxu1 %v4429_v16  ;;  %3523 = vmatpush3.bf16.msra.mxu1 %v3520_v26  ;;  %v3540_v16 = vpack.c.bf16 %v1700_v39, %v1699_v15  ;;  %v2021_v26 = vld [vmem:[#allocation10 + $0x70] sm:$0xff]  ;;  %v2430_v39 = vld [vmem:[%s4573_s4] ss:$0 sm:$0xff] }
 0x20c   : > { %3525 = vmatprep.subr.bf16.mxu1 %v3524_v31 }
 0x20e   : > { %3078 = vmatmul.mubr.f32.gmra.mrb[6].mxu1 %v4053_v9  ;;  %v3544_v9 = vpack.c.bf16 %v1840_v41, %v1839_v40 }
 0x20f   : > { %3527 = vmatpush3.bf16.msra.mxu1 %v3524_v31  ;;  %3112 = vmatprep.mubr.f32.mxu1 %v4385_v28  ;;  %v3548_v28 = vpack.c.bf16 %v1842_v44, %v1841_v43  ;;  %v2136_v31 = vld [vmem:[#allocation12 + $0x8] sm:$0xff] }
 0x210   : > { %3529 = vmatprep.subr.bf16.mxu1 %v3528_v62  ;;  %v3608_v32 = vpack.c.bf16 %v2136_v31, %v2135_v30  ;;  %v2150_v30 = vld [vmem:[#allocation12 + $0x78] sm:$0xff] }
 0x213   : > { %3531 = vmatpush3.bf16.msra.mxu1 %v3528_v62 }
 0x214   : > { %3533 = vmatprep.subr.bf16.mxu1 %v3532_v6 }
 0x217   : > { %3535 = vmatpush3.bf16.msra.mxu1 %v3532_v6 }
 0x218   : > { %3537 = vmatprep.subr.bf16.mxu1 %v3536_v38 }
 0x21b   : > { %3539 = vmatpush3.bf16.msra.mxu1 %v3536_v38 }
 0x21c   : > { %3541 = vmatprep.subr.bf16.mxu1 %v3540_v16 }
 0x21f   : > { %3543 = vmatpush3.bf16.msra.mxu1 %v3540_v16 }
 0x220   : > { %3545 = vmatprep.subr.bf16.mxu1 %v3544_v9 }
 0x222   : > { %3113 = vmatmul.mubr.f32.vlgmr.msra.gmra.mrb[0].mxu1 %v4393_v35  ;;  %v3560_v35 = vpack.c.bf16 %v1848_v58, %v1847_v57 }
 0x223   : > { %3115 = vmatprep.mubr.f32.mxu1 %v4391_v34  ;;  %3547 = vmatpush3.bf16.msra.mxu1 %v3544_v9  ;;  %v1675_v34 = vld [vmem:[#allocation2 + $0x91] sm:$0xff] }
 0x224   : > { %3549 = vmatprep.subr.bf16.mxu1 %v3548_v28 }
 0x226   : > { %3116 = vmatmul.mubr.f32.gmra.mrb[2].mxu1 %v4399_v45  ;;  %v1851_v45 = vld [vmem:[#allocation9 + $0x460] sm:$0xff] }
 0x227   : > { %3118 = vmatprep.mubr.f32.mxu1 %v4397_v42  ;;  %3551 = vmatpush3.bf16.msra.mxu1 %v3548_v28  ;;  %v3564_v42 = vpack.c.bf16 %v1850_v1, %v1849_v0  ;;  %v3568_v3 = vpack.c.bf16 %v1852_v29, %v1851_v45  ;;  %v2137_v28 = vld [vmem:[#allocation12 + $0x10] sm:$0xff]  ;;  %v2139_v0 = vld [vmem:[#allocation12 + $0x20] sm:$0xff]  ;;  %v2140_v1 = vld [vmem:[#allocation12 + $0x28] sm:$0xff] }
 0x228   : > { %3553 = vmatprep.subr.bf16.mxu1 %v3552_v49  ;;  %v3612_v58 = vpack.c.bf16 %v2138_v46, %v2137_v28 }
 0x22a   : > { %3119 = vmatmul.mubr.f32.gmra.mrb[4].mxu1 %v4408_v59  ;;  %v1853_v59 = vld [vmem:[#allocation9 + $0x470] sm:$0xff] }
 0x22b   : > { %3121 = vmatprep.mubr.f32.mxu1 %v4405_v56  ;;  %3555 = vmatpush3.bf16.msra.mxu1 %v3552_v49  ;;  %v3572_v56 = vpack.c.bf16 %v1854_v5, %v1853_v59 }
 0x22c   : > { %3557 = vmatprep.subr.bf16.mxu1 %v3556_v55 }
 0x22e   : > { %3122 = vmatmul.mubr.f32.gmra.mrb[6].mxu1 %v1675_v34 }
 0x22f   : > { %3559 = vmatpush3.bf16.msra.mxu1 %v3556_v55  ;;  %3156 = vmatprep.mubr.f32.mxu1 %v4451_v48  ;;  %v2010_v48 = vld [vmem:[#allocation10 + $0x18] sm:$0xff] }
 0x230   : > { %3561 = vmatprep.subr.bf16.mxu1 %v3560_v35  ;;  %v3580_v13 = vpack.c.bf16 %v2010_v48, %v2009_v11  ;;  %v2141_v11 = vld [vmem:[#allocation12 + $0x30] sm:$0xff] }
 0x231   : > { %v3620_v20 = vpack.c.bf16 %v2142_v12, %v2141_v11 }
 0x232   : > { %3581 = vmatprep.subr.bf16.mxu0 %v3580_v13 }
 0x233   : > { %3563 = vmatpush3.bf16.msra.mxu1 %v3560_v35  ;;  %3583 = vmatpush3.bf16.msra.mxu0 %v3580_v13 }
 0x234   : > { %3565 = vmatprep.subr.bf16.mxu1 %v3564_v42  ;;  %3585 = vmatprep.subr.bf16.mxu0 %v3584_v18 }
 0x237   : > { %3567 = vmatpush3.bf16.msra.mxu1 %v3564_v42  ;;  %3587 = vmatpush3.bf16.msra.mxu0 %v3584_v18 }
 0x238   : > { %3569 = vmatprep.subr.bf16.mxu1 %v3568_v3  ;;  %3589 = vmatprep.subr.bf16.mxu0 %v3588_v21 }
 0x23b   : > { %3571 = vmatpush3.bf16.msra.mxu1 %v3568_v3  ;;  %3591 = vmatpush3.bf16.msra.mxu0 %v3588_v21 }
 0x23c   : > { %3573 = vmatprep.subr.bf16.mxu1 %v3572_v56 }
 0x23f   : > { %3575 = vmatpush3.bf16.msra.mxu1 %v3572_v56  ;;  %v3616_v56 = vpack.c.bf16 %v2140_v1, %v2139_v0 }
 0x242   : > { %3157 = vmatmul.mubr.f32.vlgmr.msra.gmra.mrb[0].mxu1 %v4455_v52  ;;  %v2015_v52 = vld [vmem:[#allocation10 + $0x40] sm:$0xff] }
 0x243   : > { %3159 = vmatprep.mubr.f32.mxu1 %v4459_v53  ;;  %v1829_v53 = vld [vmem:[#allocation2 + $0x92] sm:$0xff]  ;;  %v3592_v23 = vpack.c.bf16 %v2016_v22, %v2015_v52  ;;  %v2143_v52 = vld [vmem:[#allocation12 + $0x40] sm:$0xff]  ;;  %v2144_v22 = vld [vmem:[#allocation12 + $0x48] sm:$0xff] }
 0x245   : > { %3593 = vmatprep.subr.bf16.mxu0 %v3592_v23 }
 0x246   : > { %3160 = vmatmul.mubr.f32.gmra.mrb[2].mxu1 %v4463_v60  ;;  %v2018_v60 = vld [vmem:[#allocation10 + $0x58] sm:$0xff]  ;;  %3595 = vmatpush3.bf16.msra.mxu0 %v3592_v23 }
 0x247   : > { %3162 = vmatprep.mubr.f32.mxu1 %v4467_v61  ;;  %v3596_v24 = vpack.c.bf16 %v2018_v60, %v2017_v54  ;;  %v2019_v61 = vld [vmem:[#allocation10 + $0x60] sm:$0xff]  ;;  %v3624_v54 = vpack.c.bf16 %v2144_v22, %v2143_v52  ;;  %v2145_v60 = vld [vmem:[#allocation12 + $0x50] sm:$0xff] }
 0x249   : > { %3597 = vmatprep.subr.bf16.mxu0 %v3596_v24 }
 0x24a   : > { %3163 = vmatmul.mubr.f32.gmra.mrb[4].mxu1 %v4471_v2  ;;  %3599 = vmatpush3.bf16.msra.mxu0 %v3596_v24  ;;  %v3600_v2 = vpack.c.bf16 %v2020_v25, %v2019_v61  ;;  %v2146_v24 = vld [vmem:[#allocation12 + $0x58] sm:$0xff]  ;;  %v3820_v61 = vld [vmem:[%s4339_s9] sm:$0xff] }
 0x24b   : > { %3165 = vmatprep.mubr.f32.mxu1 %v4475_v4  ;;  %v2022_v4 = vld [vmem:[#allocation10 + $0x78] sm:$0xff]  ;;  %v3628_v25 = vpack.c.bf16 %v2146_v24, %v2145_v60 }
 0x24c   : > { %3601 = vmatprep.subr.bf16.mxu0 %v3600_v2  ;;  %v3604_v27 = vpack.c.bf16 %v2022_v4, %v2021_v26  ;;  %v2148_v26 = vld [vmem:[#allocation12 + $0x68] sm:$0xff] }
 0x24e   : > { %3166 = vmatmul.mubr.f32.gmra.mrb[6].mxu1 %v1829_v53  ;;  %3603 = vmatpush3.bf16.msra.mxu0 %v3600_v2  ;;  %v2147_v2 = vld [vmem:[#allocation12 + $0x60] sm:$0xff] }
 0x24f   : > { %3605 = vmatprep.subr.bf16.mxu0 %v3604_v27  ;;  %v3632_v4 = vpack.c.bf16 %v2148_v26, %v2147_v2 }
 0x252   : > { %3607 = vmatpush3.bf16.msra.mxu0 %v3604_v27  ;;  %v2149_v27 = vld [vmem:[#allocation12 + $0x70] sm:$0xff] }
 0x253   : > { %3609 = vmatprep.subr.bf16.mxu0 %v3608_v32  ;;  %v3636_v31 = vpack.c.bf16 %v2150_v30, %v2149_v27 }
 0x2b3   : > { %v2894_v33 = vpop.f32.mrb[8].mxu0 }
 0x2b4   : > { %v996_v62 = vpop.f32.mrb[9].mxu0 }
 0x2b7   : > { %v2897_v63 = vpop.f32.mrb[10].mxu0 }
 0x2b8   : > { %v1006_v36 = vpop.f32.mrb[11].mxu0 }
 0x2bb   : > { %v2900_v6 = vpop.f32.mrb[12].mxu0 }
 0x2bc   : > { %v1016_v7 = vpop.f32.mrb[13].mxu0 }
 0x2bf   : > { %v2903_v37 = vpop.f32.mrb[14].mxu0 }
 0x2c0   : > { %v1026_v38 = vpop.f32.mrb[15].mxu0 }
 0x315   : > { %v3158_v15 = vpop.f32.mrb[0].mxu1 }
 0x316   : > { %v3640_v16 = vadd.f32 %v3158_v15, %v2894_v33  ;;  %v1921_v40 = vpop.f32.mrb[1].mxu1  ;;  %v3822_v33 = vld [vmem:[%s4339_s9 + $0x10] sm:$0xff] }
 0x317   : > { %v3641_v41 = vadd.f32 %v1921_v40, %v996_v62  ;;  %v3823_v62 = vld [vmem:[%s4339_s9 + $0x18] sm:$0xff] }
 0x318   : > { %v1992_v9 = vadd.f32 %v3640_v16, %v2430_v39 }
 0x319   : > { %v1991_v43 = vadd.f32 %v3641_v41, %v2430_v39  ;;  %v3161_v44 = vpop.f32.mrb[2].mxu1 }
 0x31a   : > { %v3642_v47 = vadd.f32 %v3161_v44, %v2897_v63  ;;  %v1931_v49 = vpop.f32.mrb[3].mxu1  ;;  %v2000_v55 = vmax.f32 %v1992_v9, 0.0  ;;  %v3824_v63 = vld [vmem:[%s4339_s9 + $0x20] sm:$0xff] }
 0x31b   : > { %v1999_v50 = vmax.f32 %v1991_v43, 0.0  ;;  %v3643_v51 = vadd.f32 %v1931_v49, %v1006_v36  ;;  %v3825_v36 = vld [vmem:[%s4339_s9 + $0x28] sm:$0xff] }
 0x31c   : > { %v1994_v57 = vadd.f32 %v3642_v47, %v2430_v39 }
 0x31d   : > { %v1993_v34 = vadd.f32 %v3643_v51, %v2430_v39  ;;  %v3164_v35 = vpop.f32.mrb[4].mxu1  ;;  %3200 = vmatprep.mubr.f32.mxu0 %v1999_v50 }
 0x31e   : > { %v3644_v42 = vadd.f32 %v3164_v35, %v2900_v6  ;;  %v1941_v45 = vpop.f32.mrb[5].mxu1  ;;  %3201 = vmatmul.mubr.f32.vlgmr.msra.gmra.mrb[16].mxu0 %v2000_v55  ;;  %v2002_v59 = vmax.f32 %v1994_v57, 0.0  ;;  %v3826_v6 = vld [vmem:[%s4339_s9 + $0x30] sm:$0xff] }
 0x31f   : > { %v2001_v29 = vmax.f32 %v1993_v34, 0.0  ;;  %v3645_v3 = vadd.f32 %v1941_v45, %v1016_v7  ;;  %3611 = vmatpush3.bf16.msra.mxu0 %v3608_v32  ;;  %v3821_v32 = vld [vmem:[%s4339_s9 + $0x8] sm:$0xff]  ;;  %v3827_v7 = vld [vmem:[%s4339_s9 + $0x38] sm:$0xff]  ;;  %s4602_s9 = sld [smem:[#allocation20_spill]] }
 0x320   : > { %v1996_v5 = vadd.f32 %v3644_v42, %v2430_v39  ;;  %3613 = vmatprep.subr.bf16.mxu0 %v3612_v58 }
 0x321   : > { %v1995_v8 = vadd.f32 %v3645_v3, %v2430_v39  ;;  %v3167_v10 = vpop.f32.mrb[6].mxu1  ;;  %3203 = vmatprep.mubr.f32.mxu0 %v2001_v29 }
 0x322   : > { %v3646_v48 = vadd.f32 %v3167_v10, %v2903_v37  ;;  %v1951_v13 = vpop.f32.mrb[7].mxu1  ;;  %3204 = vmatmul.mubr.f32.gmra.mrb[18].mxu0 %v2002_v59  ;;  %v2004_v18 = vmax.f32 %v1996_v5, 0.0  ;;  %v2431_v37 = vld [vmem:[%s4575_s6] ss:$0 sm:$0xff] }
 0x323   : > { %v2003_v14 = vmax.f32 %v1995_v8, 0.0  ;;  %v3647_v17 = vadd.f32 %v1951_v13, %v1026_v38  ;;  %3615 = vmatpush3.bf16.msra.mxu0 %v3612_v58  ;;  %v2432_v38 = vld [vmem:[%s4577_s8] ss:$0 sm:$0xff] }
 0x324   : > { %v1998_v19 = vadd.f32 %v3646_v48, %v2430_v39  ;;  %3617 = vmatprep.subr.bf16.mxu0 %v3616_v56  ;;  %v3654_v16 = vadd.f32 %v2432_v38, %v2431_v37 }
 0x325   : > { %v1997_v21 = vadd.f32 %v3647_v17, %v2430_v39  ;;  %3206 = vmatprep.mubr.f32.mxu0 %v2003_v14  ;;  %s4525_s15 = scalar_lea.hbm %s4602_s9, %s2439_s23 }
 0x326   : > { %3207 = vmatmul.mubr.f32.gmra.mrb[20].mxu0 %v2004_v18  ;;  %v2006_v23 = vmax.f32 %v1998_v19, 0.0 }
 0x327   : > { %v2005_v53 = vmax.f32 %v1997_v21, 0.0  ;;  %3619 = vmatpush3.bf16.msra.mxu0 %v3616_v56 }
 0x328   : > { %3621 = vmatprep.subr.bf16.mxu0 %v3620_v20 }
 0x329   : > { %3209 = vmatprep.mubr.f32.mxu0 %v2005_v53 }
 0x32a   : > { %3210 = vmatmul.mubr.f32.gmra.mrb[22].mxu0 %v2006_v23 }
 0x32b   : > { %3623 = vmatpush3.bf16.msra.mxu0 %v3620_v20  ;;  %3244 = vmatprep.mubr.f32.mxu0 %v3820_v61 }
 0x32c   : > { %3625 = vmatprep.subr.bf16.mxu0 %v3624_v54 }
 0x32f   : > { %3627 = vmatpush3.bf16.msra.mxu0 %v3624_v54 }
 0x330   : > { %3629 = vmatprep.subr.bf16.mxu0 %v3628_v25 }
 0x333   : > { %3631 = vmatpush3.bf16.msra.mxu0 %v3628_v25 }
 0x334   : > { %3633 = vmatprep.subr.bf16.mxu0 %v3632_v4 }
 0x337   : > { %3635 = vmatpush3.bf16.msra.mxu0 %v3632_v4 }
 0x338   : > { %3637 = vmatprep.subr.bf16.mxu0 %v3636_v31 }
 0x33b   : > { %3639 = vmatpush3.bf16.msra.mxu0 %v3636_v31 }
 0x33e   : > { %3245 = vmatmul.mubr.f32.vlgmr.msra.gmra.mrb[16].mxu0 %v3821_v32 }
 0x33f   : > { %3247 = vmatprep.mubr.f32.mxu0 %v3822_v33 }
 0x342   : > { %3248 = vmatmul.mubr.f32.gmra.mrb[18].mxu0 %v3823_v62 }
 0x343   : > { %3250 = vmatprep.mubr.f32.mxu0 %v3824_v63 }
 0x346   : > { %3251 = vmatmul.mubr.f32.gmra.mrb[20].mxu0 %v3825_v36 }
 0x347   : > { %3253 = vmatprep.mubr.f32.mxu0 %v3826_v6 }
 0x34a   : > { %3254 = vmatmul.mubr.f32.gmra.mrb[22].mxu0 %v3827_v7 }
 0x411   : > { %v3246_v15 = vpop.f32.mrb[16].mxu0 }
 0x412   : > { %v3648_v39 = vadd.f32 %v3246_v15, %v2431_v37  ;;  %v2224_v40 = vpop.f32.mrb[17].mxu0 }
 0x413   : > { %v3650_v41 = vadd.f32 %v2431_v37, %v2224_v40 }
 0x414   : > { %v3649_v9 = vadd.f32 %v3648_v39, %v2432_v38 }
 0x415   : > { %v3651_v43 = vadd.f32 %v3650_v41, %v2432_v38  ;;  %v3249_v44 = vpop.f32.mrb[18].mxu0 }
 0x416   : > { %v2272_v28 = vmax.f32 %v3649_v9, 0.0  ;;  %v3653_v46 = vadd.f32 %v3654_v16, %v3249_v44  ;;  %v2234_v47 = vpop.f32.mrb[19].mxu0 }
 0x417   : > { %v2271_v49 = vmax.f32 %v3651_v43, 0.0  ;;  %v3655_v50 = vadd.f32 %v3654_v16, %v2234_v47 }
 0x418   : > { %2280 = vst [vmem:[%s408_s18 + $0x8] sm:$0xff] %v2272_v28  ;;  %v2274_v51 = vmax.f32 %v3653_v46, 0.0 }
 0x419   : > { %2279 = vst [vmem:[%s408_s18] sm:$0xff] %v2271_v49  ;;  %v2273_v55 = vmax.f32 %v3655_v50, 0.0  ;;  %v3252_v57 = vpop.f32.mrb[20].mxu0 }
 0x41a   : > { %2282 = vst [vmem:[%s408_s18 + $0x18] sm:$0xff] %v2274_v51  ;;  %v3657_v58 = vadd.f32 %v3654_v16, %v3252_v57  ;;  %v2244_v34 = vpop.f32.mrb[21].mxu0 }
 0x41b   : > { %2281 = vst [vmem:[%s408_s18 + $0x10] sm:$0xff] %v2273_v55  ;;  %v3659_v35 = vadd.f32 %v3654_v16, %v2244_v34 }
 0x41c   : > { %v2276_v0 = vmax.f32 %v3657_v58, 0.0 }
 0x41d   : > { %v2275_v1 = vmax.f32 %v3659_v35, 0.0  ;;  %v3255_v42 = vpop.f32.mrb[22].mxu0 }
 0x41e   : > { %2284 = vst [vmem:[%s408_s18 + $0x28] sm:$0xff] %v2276_v0  ;;  %v3661_v45 = vadd.f32 %v3654_v16, %v3255_v42  ;;  %v2254_v29 = vpop.f32.mrb[23].mxu0 }
 0x41f   : > { %2283 = vst [vmem:[%s408_s18 + $0x20] sm:$0xff] %v2275_v1  ;;  %v3663_v3 = vadd.f32 %v3654_v16, %v2254_v29 }
 0x420   : > { %v2278_v59 = vmax.f32 %v3661_v45, 0.0 }
 0x421   : > { %v2277_v5 = vmax.f32 %v3663_v3, 0.0 }
 0x422   : > { %2286 = vst [vmem:[%s408_s18 + $0x38] sm:$0xff] %v2278_v59 }
 0x423   : > { %2285 = vst [vmem:[%s408_s18 + $0x30] sm:$0xff] %v2277_v5 }
 0x424   : > { %3983 = shalt.err (!%p3980_p13)
}
 0x425   : > { %s3984_s22 = scalar_lea.hbm %s4525_s15, 1024  ;;  %s3988_s18 = scalar_lea.hbm %s4602_s9, 2048 }
 0x426   : > { %p3985_p9 = scmp.ne.s32.totalorder %s4525_s15, %s3984_s22  ;;  %p3989_p4 = scmp.lt.u32.totalorder %s4525_s15, %s4602_s9 }
 0x427   : > { %p3990_p8 = scmp.lt.u32.totalorder %s3988_s18, %s3984_s22  ;;  %p3992_p3 = scmp.lt.u32.totalorder %s3984_s22, %s4525_s15 }
 0x428   : > { %p3986_p0 = pnand %p3985_p9, %p4278_p10 }
 0x429   : > { %p3991_p6 = por %p3990_p8, %p3989_p4 }
 0x42a   : > { %p3987_p11 = pneg %p3986_p0 }
 0x42b   : > { %p3993_p5 = por %p3992_p3, %p3991_p6 }
 0x42d   : > { %p3994_p7 = pnand %p3993_p5, %p3987_p11 }
 0x42f   : > { %3997 = shalt.err (!%p3994_p7)
}
 0x430   : > { %s4055_s24 = smov 128   ;;  %s4056_s17 = smov 8  }
 0x431   : > { %3746 = dma.vmem_to_hbm [thread:$0]  (%p4278_p10), %s4520_s16, 1024, %s4525_s15, %s2288_s13, %s4055_s24, %s4055_s24, %s4056_s17  }
 0x432 PF: > { %s4603_s25 = sld [smem:[#allocation18_spill]]  ;;  %s4604_s26 = sld [smem:[#allocation19_spill]] }
 0x433   : > { %p4606_p1 = scmp.ge.s32.totalorder %s4044_s12, 2 }
 0x438   : > { %s2316_s19 = sand.u32 1, %s4603_s25   ;;  %p4605_p12 = scmp.ne.s32.totalorder %s4604_s26, 0 }
 0x439   : > { %s2317_s22 = scalar_lea.sflag [#allocation6], %s2316_s19 }
 0x43a   : > { %p3766_p2 = pnand %p4606_p1, %p4605_p12 }
 0x43c   : > { %4027 = dma.done.wait (!%p3766_p2), %s2317_s22, 1024  }
 0x43d   : > { %4029 = vsyncadd (!%p3766_p2), %s2317_s22, 4294966272  ;;  %p24_p13 = scmp.ge.s32.totalorder %s4268_s14, 4   ;;  %s4607_s30 = smov %s4036_s10 }
 0x43e   : > { %s4608_s10 = smov %s4040_s11  ;;  %s4609_s11 = smov %s4284_s28 }
 0x43f   : > { %s4610_s12 = smov %s4268_s14  ;;  %26 = sbr.rel (!%p24_p13) target bundleno = 9 (0x9), region = 127 }
 0x446   :  { %2322 = vsyncpa [#allocation5], 1 }
 0x447   :  { %2324 = vsyncpa [#allocation5 + $0x1], 1 }
 0x448   :  { %2325 = vsyncpa [#allocation8], 1 }
 0x449   :  { %2326 = vsyncpa [#allocation11], 1 }
 0x44a   :  { %2327 = vsyncpa [#allocation6], 1 }
 0x44b   :  { %2329 = vsyncpa [#allocation6 + $0x1], 1 }

</bundles_post_ra>
